<compile_context>
chip_gen: v7x
topology: tpu7x:2x2x1
jax: 0.10.0
libtpu: 0.0.40
codegen_flags: <defaults>
</compile_context>

<pallas_src>
import numpy as np
import jax
import jax.numpy as jnp
from jax import lax
from jax.experimental import pallas as pl
from jax.experimental.pallas import tpu as pltpu

EPS = 1e-5          # GroupNorm eps (PyTorch default)
NEG_SLOPE = 0.2     # LeakyReLU negative slope


def chebyshev_taps(K):
    """All (dy, dx) offsets of a KxK stencil, ordered by Chebyshev radius so the
    first k*k taps are exactly the kxk stencil for every odd k <= K."""
    P = K // 2
    taps = [(dy, dx) for dy in range(-P, P + 1) for dx in range(-P, P + 1)]
    taps.sort(key=lambda t: (max(abs(t[0]), abs(t[1])), t[0], t[1]))
    return taps


# ----------------------------------------------------------------------------
# Pallas kernel: one Multi_Scale_Conv_Block, one (sample, group) per grid step
# ----------------------------------------------------------------------------
def inception_block_pallas(xs, pp, *, H, W, Chid, Cout, incep_ker, groups):
    """xs: list of (B, Cin_a, H*W) f32 activations (2 for decoder skip blocks).
    Returns (B, Cout, H*W) f32."""
    B = xs[0].shape[0]
    HW = H * W
    G = groups
    cg_in = Chid // G
    cg_out = Cout // G
    K = max(incep_ker)
    KK = K * K
    NB = len(incep_ker)
    n_in = len(xs)
    taps = chebyshev_taps(K)
    cins = [int(x.shape[1]) for x in xs]

    def kernel(*refs):
        r = 0
        x_refs = refs[r:r + n_in]; r += n_in
        w1_refs = refs[r:r + n_in]; r += n_in
        b1_ref = refs[r]; r += 1
        wk_refs = refs[r:r + NB]; r += NB
        ball_ref, gam_ref, bet_ref, mask_ref = refs[r:r + 4]; r += 4
        o_ref = refs[r]
        col_ref = refs[r + 1]

        # ---- 1x1 conv for this group's hidden channels (bf16 MXU, f32 acc) --
        # Decoder blocks sum two partial dots (z and the skip) -> no HBM concat.
        acc1 = None
        for a in range(n_in):
            d = jnp.dot(w1_refs[a][0], x_refs[a][0].astype(jnp.bfloat16),
                        preferred_element_type=jnp.float32)
            acc1 = d if acc1 is None else acc1 + d
        hid = acc1 + b1_ref[0]                           # (cg_in, HW) f32

        # ---- im2col slab (Chebyshev tap order), bf16, lane shifts on the XLU -
        for t, (dy, dx) in enumerate(taps):
            s = dy * W + dx
            sh = hid if s == 0 else pltpu.roll(hid, shift=(-s) % HW, axis=1)
            col_ref[pl.ds(t * cg_in, cg_in), :] = \
                (sh * mask_ref[t]).astype(jnp.bfloat16)

        # ---- per-branch prefix dot + GroupNorm + LeakyReLU, summed ----------
        ball = ball_ref[0]                               # (NB*cg_out, 1) f32
        gam = gam_ref[0]
        bet = bet_ref[0]
        inv_n = 1.0 / float(cg_out * HW)
        out = None
        for b, kb in enumerate(incep_ker):
            nt = kb * kb                                 # taps used by branch b
            y = jnp.dot(wk_refs[b][0], col_ref[pl.ds(0, nt * cg_in), :],
                        preferred_element_type=jnp.float32)
            y = y + ball[b * cg_out:(b + 1) * cg_out, :]
            # two-pass (centered) GroupNorm statistics, f32
            mean = jnp.sum(jnp.sum(y, axis=1, keepdims=True),
                           axis=0, keepdims=True) * inv_n
            d0 = y - mean
            var = jnp.sum(jnp.sum(d0 * d0, axis=1, keepdims=True),
                          axis=0, keepdims=True) * inv_n
            scale = lax.rsqrt(var + EPS) * gam[b * cg_out:(b + 1) * cg_out, :]
            yb = d0 * scale + bet[b * cg_out:(b + 1) * cg_out, :]
            yb = jnp.where(yb > 0, yb, NEG_SLOPE * yb)   # LeakyReLU(0.2)
            out = yb if out is None else out + yb
        o_ref[0] = out                                   # lane-dense f32 store

    in_specs = []
    for ca in cins:                                   # activations (shared over g)
        in_specs.append(pl.BlockSpec((1, ca, HW), lambda i, g: (i, 0, 0)))
    for ca in cins:                                   # 1x1 weight slices (per g)
        in_specs.append(pl.BlockSpec((1, cg_in, ca), lambda i, g: (g, 0, 0)))
    in_specs.append(pl.BlockSpec((1, cg_in, 1), lambda i, g: (g, 0, 0)))       # b1
    for kb in incep_ker:                              # per-branch conv weights
        in_specs.append(pl.BlockSpec((1, cg_out, kb * kb * cg_in),
                                     lambda i, g: (g, 0, 0)))
    for _ in range(3):                                # conv bias, GN gamma/beta
        in_specs.append(pl.BlockSpec((1, NB * cg_out, 1), lambda i, g: (g, 0, 0)))
    # TODO(synk): pipeline_mode=pl.Buffered(1) on this constant-index mask spec
    # would drop one VMEM buffer; left at the default for portability.
    in_specs.append(pl.BlockSpec((KK, 1, HW), lambda i, g: (0, 0, 0)))         # masks

    args = (list(xs) + list(pp["w1_parts"]) + [pp["b1"]] + list(pp["wks"])
            + [pp["ball"], pp["gam"], pp["bet"], pp["masks"]])

    return pl.pallas_call(
        kernel,
        out_shape=jax.ShapeDtypeStruct((B, Cout, HW), jnp.float32),
        grid=(B, G),
        in_specs=in_specs,
        out_specs=pl.BlockSpec((1, cg_out, HW), lambda i, g: (i, g, 0)),
        scratch_shapes=[pltpu.VMEM((KK * cg_in, HW), jnp.bfloat16)],  # im2col slab
        compiler_params=pltpu.CompilerParams(
            dimension_semantics=("parallel", "parallel"),
            vmem_limit_bytes=64 * 1024 * 1024),
    )(*args)


# ----------------------------------------------------------------------------
# Deterministic parameter init (plain JAX / numpy glue)
# ----------------------------------------------------------------------------
def init_block_params(key, Cin, Chid, Cout, incep_ker, G):
    NB = len(incep_ker)
    ks = jax.random.split(key, 2 + 4 * NB)
    cg_in = Chid // G
    p = {
        "w1": jax.random.normal(ks[0], (Chid, Cin), jnp.float32) / np.sqrt(Cin),
        "b1": 0.1 * jax.random.normal(ks[1], (Chid,), jnp.float32),
        "wk": [], "bk": [], "gamma": [], "beta": [],
    }
    for i, k in enumerate(incep_ker):
        kk = ks[2 + 4 * i: 6 + 4 * i]
        # grouped conv weights in OIHW: (Cout, Chid//G, k, k)
        p["wk"].append(jax.random.normal(kk[0], (Cout, cg_in, k, k), jnp.float32)
                       / np.sqrt(k * k * cg_in))
        p["bk"].append(0.1 * jax.random.normal(kk[1], (Cout,), jnp.float32))
        p["gamma"].append(1.0 + 0.1 * jax.random.normal(kk[2], (Cout,), jnp.float32))
        p["beta"].append(0.1 * jax.random.normal(kk[3], (Cout,), jnp.float32))
    return p


def prepare_block_params(p, cin_splits, Chid, Cout, incep_ker, G, H, W):
    """Group-tiled, Chebyshev-tap-ordered, bf16 packing of one block's params."""
    K = max(incep_ker)
    KK = K * K
    HW = H * W
    NB = len(incep_ker)
    cg_in = Chid // G
    cg_out = Cout // G
    assert Chid % G == 0 and Cout % G == 0, "channel counts must divide groups"
    assert cg_in % 8 == 0 and cg_out % 8 == 0, (
        "group-tiled layout needs 8-aligned per-group channels "
        f"(got Chid/G={cg_in}, Cout/G={cg_out})")
    assert HW % 128 == 0, "H*W must be lane-aligned (multiple of 128)"
    assert all(k % 2 == 1 for k in incep_ker), "odd kernel sizes only"
    taps = chebyshev_taps(K)

    # 1x1 conv weight, split along Cin (decoder skip avoids the HBM concat) and
    # group-packed to (G, cg_in, cin_a), bf16 for the MXU.
    w1 = np.asarray(p["w1"])
    w1_parts, off = [], 0
    for ca in cin_splits:
        w1_parts.append(jnp.asarray(
            w1[:, off:off + ca].reshape(G, cg_in, ca), jnp.bfloat16))
        off += ca
    assert off == w1.shape[1]
    b1 = jnp.asarray(np.asarray(p["b1"]).reshape(G, cg_in, 1), jnp.float32)

    # per-branch grouped-conv weights: (G, cg_out, kb*kb*cg_in), Chebyshev order
    wks = []
    for b, kb in enumerate(incep_ker):
        w = np.asarray(p["wk"][b])                    # (Cout, cg_in, kb, kb)
        pad = kb // 2
        pk = np.zeros((G, cg_out, kb * kb * cg_in), np.float32)
        for t, (dy, dx) in enumerate(taps[:kb * kb]):
            pk[:, :, t * cg_in:(t + 1) * cg_in] = \
                w[:, :, dy + pad, dx + pad].reshape(G, cg_out, cg_in)
        wks.append(jnp.asarray(pk, jnp.bfloat16))

    # conv biases / GroupNorm affine, per group, branches concatenated
    ball = np.zeros((G, NB * cg_out, 1), np.float32)
    gam = np.zeros((G, NB * cg_out, 1), np.float32)
    bet = np.zeros((G, NB * cg_out, 1), np.float32)
    for b in range(NB):
        sl = slice(b * cg_out, (b + 1) * cg_out)
        ball[:, sl, 0] = np.asarray(p["bk"][b]).reshape(G, cg_out)
        gam[:, sl, 0] = np.asarray(p["gamma"][b]).reshape(G, cg_out)
        bet[:, sl, 0] = np.asarray(p["beta"][b]).reshape(G, cg_out)

    # per-tap border-validity masks over the flat H*W axis (Chebyshev order)
    masks = np.zeros((KK, 1, HW), np.float32)
    hh, ww = np.meshgrid(np.arange(H), np.arange(W), indexing="ij")
    for t, (dy, dx) in enumerate(taps):
        valid = ((hh + dy >= 0) & (hh + dy < H) & (ww + dx >= 0) & (ww + dx < W))
        masks[t, 0] = valid.reshape(-1).astype(np.float32)

    return {"w1_parts": w1_parts, "b1": b1, "wks": wks,
            "ball": jnp.asarray(ball), "gam": jnp.asarray(gam),
            "bet": jnp.asarray(bet), "masks": jnp.asarray(masks)}


def build_midincepnet(key, channel_in, channel_hid, N2, incep_ker, groups, H, W):
    assert N2 >= 2 and len(incep_ker) > 1
    chid2 = channel_hid // 2
    enc_shapes = [((channel_in,), chid2, channel_hid)]
    for _ in range(1, N2 - 1):
        enc_shapes.append(((channel_hid,), chid2, channel_hid))
    enc_shapes.append(((channel_hid,), chid2, channel_hid))
    dec_shapes = [((channel_hid,), chid2, channel_hid)]
    for _ in range(1, N2 - 1):
        dec_shapes.append(((channel_hid, channel_hid), chid2, channel_hid))
    dec_shapes.append(((channel_hid, channel_hid), chid2, channel_in))

    keys = jax.random.split(key, len(enc_shapes) + len(dec_shapes))
    net = {"N2": N2, "G": groups, "incep_ker": tuple(incep_ker),
           "enc_params": [], "enc_pp": [], "enc_cfg": [],
           "dec_params": [], "dec_pp": [], "dec_cfg": []}

    def add(side, k, cins, ch, co):
        p = init_block_params(k, sum(cins), ch, co, incep_ker, groups)
        net[side + "_params"].append(p)
        net[side + "_pp"].append(
            prepare_block_params(p, cins, ch, co, incep_ker, groups, H, W))
        net[side + "_cfg"].append(dict(H=H, W=W, Chid=ch, Cout=co,
                                       incep_ker=tuple(incep_ker), groups=groups))

    for idx, (cins, ch, co) in enumerate(enc_shapes):
        add("enc", keys[idx], cins, ch, co)
    base = len(enc_shapes)
    for idx, (cins, ch, co) in enumerate(dec_shapes):
        add("dec", keys[base + idx], cins, ch, co)
    return net


# ----------------------------------------------------------------------------
# Forward pass (Pallas) — mirrors MidIncepNet.forward, NCHW stays flat
# ----------------------------------------------------------------------------
def midincep_forward_pallas(x5d, net):
    B, T, C, H, W = x5d.shape
    N2 = net["N2"]
    z = x5d.reshape(B, T * C, H * W)          # NCHW flattened; no transposes
    skips = []
    for i in range(N2):
        z = inception_block_pallas([z], net["enc_pp"][i], **net["enc_cfg"][i])
        if i < N2 - 1:
            skips.append(z)
    z = inception_block_pallas([z], net["dec_pp"][0], **net["dec_cfg"][0])
    for i in range(1, N2):
        # skip connection handed to the kernel as a second input -> no HBM concat
        z = inception_block_pallas([z, skips[-i]], net["dec_pp"][i],
                                   **net["dec_cfg"][i])
    return z.reshape(B, T, C, H, W)


# ----------------------------------------------------------------------------
# Pure-JAX reference (for correctness check only), NCHW like PyTorch
# ----------------------------------------------------------------------------
def ref_group_norm(y, G, gamma, beta):
    B, C, H, W = y.shape
    cg = C // G
    yr = y.reshape(B, G, cg, H, W)
    mean = yr.mean(axis=(2, 3, 4), keepdims=True)
    var = ((yr - mean) ** 2).mean(axis=(2, 3, 4), keepdims=True)
    yn = (yr - mean) * lax.rsqrt(var + EPS)
    return (yn.reshape(B, C, H, W) * gamma[None, :, None, None]
            + beta[None, :, None, None])


def ref_inception_block(x, p, *, G, incep_ker):
    h = jnp.einsum("dc,bchw->bdhw", p["w1"], x) + p["b1"][None, :, None, None]
    out = 0.0
    for i, k in enumerate(incep_ker):
        pad = k // 2
        y = lax.conv_general_dilated(
            h, p["wk"][i], (1, 1), [(pad, pad), (pad, pad)],
            dimension_numbers=("NCHW", "OIHW", "NCHW"),
            feature_group_count=G)
        y = y + p["bk"][i][None, :, None, None]
        y = ref_group_norm(y, G, p["gamma"][i], p["beta"][i])
        y = jnp.where(y > 0, y, NEG_SLOPE * y)
        out = out + y
    return out


def midincep_forward_ref(x5d, net):
    B, T, C, H, W = x5d.shape
    G, incep_ker, N2 = net["G"], net["incep_ker"], net["N2"]
    z = x5d.reshape(B, T * C, H, W)
    skips = []
    for i in range(N2):
        z = ref_inception_block(z, net["enc_params"][i], G=G, incep_ker=incep_ker)
        if i < N2 - 1:
            skips.append(z)
    z = ref_inception_block(z, net["dec_params"][0], G=G, incep_ker=incep_ker)
    for i in range(1, N2):
        z = ref_inception_block(jnp.concatenate([z, skips[-i]], axis=1),
                                net["dec_params"][i], G=G, incep_ker=incep_ker)
    return z.reshape(B, T, C, H, W)


# ----------------------------------------------------------------------------
if __name__ == "__main__":
    # Small deterministic config, chosen so every per-group channel slab is
    # 8-sublane aligned (see asserts in prepare_block_params).
    B, T, C, H, W = 2, 8, 4, 16, 16
    channel_in = T * C          # 32
    channel_hid = 64            # per-block conv hidden Chid = 32
    N2 = 2
    incep_ker = (3, 5)          # multi-scale kernel sizes (len > 1)
    groups = 4

    key = jax.random.PRNGKey(0)
    kx, kp = jax.random.split(key)
    x = jax.random.normal(kx, (B, T, C, H, W), jnp.float32)

    net = build_midincepnet(kp, channel_in, channel_hid, N2, incep_ker, groups,
                            H, W)

    y = jax.block_until_ready(midincep_forward_pallas(x, net))
    assert y.shape == (B, T, C, H, W)

    y_ref = jax.block_until_ready(midincep_forward_ref(x, net))
    max_err = float(jnp.max(jnp.abs(y - y_ref)))
    ref_scale = float(jnp.max(jnp.abs(y_ref)))
    # bf16 MXU operands with f32 accumulation, compounded across 2*N2 blocks ->
    # relative tolerance vs the full-f32 reference (documented, not a bug).
    assert max_err <= 5e-2 * ref_scale + 1e-3, \
        f"max abs diff {max_err} vs ref scale {ref_scale}"

    print("KERNEL_OK")
</pallas_src>

<mosaic_0001>
module attributes {stable_mosaic.version = 11 : i64} {
  func.func @kernel(%arg0: i32, %arg1: i32, %arg2: memref<1x32x256xf32, #tpu.memory_space<vmem>>, %arg3: memref<1x8x32xbf16, #tpu.memory_space<vmem>>, %arg4: memref<1x8x1xf32, #tpu.memory_space<vmem>>, %arg5: memref<1x16x72xbf16, #tpu.memory_space<vmem>>, %arg6: memref<1x16x200xbf16, #tpu.memory_space<vmem>>, %arg7: memref<1x32x1xf32, #tpu.memory_space<vmem>>, %arg8: memref<1x32x1xf32, #tpu.memory_space<vmem>>, %arg9: memref<1x32x1xf32, #tpu.memory_space<vmem>>, %arg10: memref<25x1x256xf32, #tpu.memory_space<vmem>>, %arg11: memref<1x16x256xf32, #tpu.memory_space<vmem>>, %arg12: memref<200x256xbf16, #tpu.memory_space<vmem>>) attributes {dimension_semantics = [#tpu.dimension_semantics<parallel>, #tpu.dimension_semantics<parallel>], iteration_bounds = array<i64: 2, 4>, scalar_prefetch = 0 : i64, scratch_operands = 1 : i64, tpu.core_type = #tpu.core_type<tc>, window_params = [{transform_indices = @transform_0, window_bounds = array<i64: 1, 32, 256>}, {transform_indices = @transform_1, window_bounds = array<i64: 1, 8, 32>}, {transform_indices = @transform_2, window_bounds = array<i64: 1, 8, 1>}, {transform_indices = @transform_3, window_bounds = array<i64: 1, 16, 72>}, {transform_indices = @transform_4, window_bounds = array<i64: 1, 16, 200>}, {transform_indices = @transform_5, window_bounds = array<i64: 1, 32, 1>}, {transform_indices = @transform_6, window_bounds = array<i64: 1, 32, 1>}, {transform_indices = @transform_7, window_bounds = array<i64: 1, 32, 1>}, {pipeline_mode = #tpu.pipeline_mode<synchronous>, transform_indices = @transform_8, window_bounds = array<i64: 25, 1, 256>}, {transform_indices = @transform_9, window_bounds = array<i64: 1, 16, 256>}]} {
    %c0 = arith.constant 0 : index
    %c0_0 = arith.constant 0 : index
    %c0_1 = arith.constant 0 : index
    %0 = vector.load %arg3[%c0, %c0_0, %c0_1] : memref<1x8x32xbf16, #tpu.memory_space<vmem>>, vector<1x8x32xbf16>
    %1 = vector.shape_cast %0 : vector<1x8x32xbf16> to vector<8x32xbf16>
    %c0_2 = arith.constant 0 : index
    %c0_3 = arith.constant 0 : index
    %c0_4 = arith.constant 0 : index
    %2 = vector.load %arg2[%c0_2, %c0_3, %c0_4] : memref<1x32x256xf32, #tpu.memory_space<vmem>>, vector<1x32x256xf32>
    %3 = vector.shape_cast %2 : vector<1x32x256xf32> to vector<32x256xf32>
    %4 = arith.truncf %3 : vector<32x256xf32> to vector<32x256xbf16>
    %cst = arith.constant dense<0.000000e+00> : vector<8x256xf32>
    %5 = tpu.matmul %1, %4, %cst {dimension_numbers = #tpu.dot_dimension_numbers<[1], [0], [0], [1], [0, 0, 1, 1], [], []>} : vector<8x32xbf16>, vector<32x256xbf16>, vector<8x256xf32> -> vector<8x256xf32>
    %c0_5 = arith.constant 0 : index
    %c0_6 = arith.constant 0 : index
    %c0_7 = arith.constant 0 : index
    %6 = vector.load %arg4[%c0_5, %c0_6, %c0_7] : memref<1x8x1xf32, #tpu.memory_space<vmem>>, vector<1x8x1xf32>
    %7 = vector.shape_cast %6 : vector<1x8x1xf32> to vector<8x1xf32>
    %8 = vector.broadcast %7 : vector<8x1xf32> to vector<8x256xf32>
    %9 = arith.addf %5, %8 : vector<8x256xf32>
    %c0_8 = arith.constant 0 : index
    %c0_9 = arith.constant 0 : index
    %c0_10 = arith.constant 0 : index
    %10 = vector.load %arg10[%c0_8, %c0_9, %c0_10] : memref<25x1x256xf32, #tpu.memory_space<vmem>>, vector<1x1x256xf32>
    %11 = vector.shape_cast %10 : vector<1x1x256xf32> to vector<1x256xf32>
    %12 = vector.broadcast %11 : vector<1x256xf32> to vector<8x256xf32>
    %13 = arith.mulf %9, %12 : vector<8x256xf32>
    %14 = arith.truncf %13 : vector<8x256xf32> to vector<8x256xbf16>
    %c0_11 = arith.constant 0 : index
    %c0_12 = arith.constant 0 : index
    %15 = vector.load %arg12[%c0_11, %c0_12] : memref<200x256xbf16, #tpu.memory_space<vmem>>, vector<8x256xbf16>
    tpu.vector_store %arg12[%c0_11, %c0_12], %14 {strides = array<i32>} : memref<200x256xbf16, #tpu.memory_space<vmem>>, vector<8x256xbf16>,
    %c17_i32 = arith.constant 17 : i32
    %16 = tpu.dynamic_rotate %9 by %c17_i32 dim 1 : vector<8x256xf32>, i32 -> vector<8x256xf32>
    %c1 = arith.constant 1 : index
    %c0_13 = arith.constant 0 : index
    %c0_14 = arith.constant 0 : index
    %17 = vector.load %arg10[%c1, %c0_13, %c0_14] : memref<25x1x256xf32, #tpu.memory_space<vmem>>, vector<1x1x256xf32>
    %18 = vector.shape_cast %17 : vector<1x1x256xf32> to vector<1x256xf32>
    %19 = vector.broadcast %18 : vector<1x256xf32> to vector<8x256xf32>
    %20 = arith.mulf %16, %19 : vector<8x256xf32>
    %21 = arith.truncf %20 : vector<8x256xf32> to vector<8x256xbf16>
    %c8 = arith.constant 8 : index
    %c0_15 = arith.constant 0 : index
    %22 = vector.load %arg12[%c8, %c0_15] : memref<200x256xbf16, #tpu.memory_space<vmem>>, vector<8x256xbf16>
    tpu.vector_store %arg12[%c8, %c0_15], %21 {strides = array<i32>} : memref<200x256xbf16, #tpu.memory_space<vmem>>, vector<8x256xbf16>,
    %c16_i32 = arith.constant 16 : i32
    %23 = tpu.dynamic_rotate %9 by %c16_i32 dim 1 : vector<8x256xf32>, i32 -> vector<8x256xf32>
    %c2 = arith.constant 2 : index
    %c0_16 = arith.constant 0 : index
    %c0_17 = arith.constant 0 : index
    %24 = vector.load %arg10[%c2, %c0_16, %c0_17] : memref<25x1x256xf32, #tpu.memory_space<vmem>>, vector<1x1x256xf32>
    %25 = vector.shape_cast %24 : vector<1x1x256xf32> to vector<1x256xf32>
    %26 = vector.broadcast %25 : vector<1x256xf32> to vector<8x256xf32>
    %27 = arith.mulf %23, %26 : vector<8x256xf32>
    %28 = arith.truncf %27 : vector<8x256xf32> to vector<8x256xbf16>
    %c16 = arith.constant 16 : index
    %c0_18 = arith.constant 0 : index
    %29 = vector.load %arg12[%c16, %c0_18] : memref<200x256xbf16, #tpu.memory_space<vmem>>, vector<8x256xbf16>
    tpu.vector_store %arg12[%c16, %c0_18], %28 {strides = array<i32>} : memref<200x256xbf16, #tpu.memory_space<vmem>>, vector<8x256xbf16>,
    %c15_i32 = arith.constant 15 : i32
    %30 = tpu.dynamic_rotate %9 by %c15_i32 dim 1 : vector<8x256xf32>, i32 -> vector<8x256xf32>
    %c3 = arith.constant 3 : index
    %c0_19 = arith.constant 0 : index
    %c0_20 = arith.constant 0 : index
    %31 = vector.load %arg10[%c3, %c0_19, %c0_20] : memref<25x1x256xf32, #tpu.memory_space<vmem>>, vector<1x1x256xf32>
    %32 = vector.shape_cast %31 : vector<1x1x256xf32> to vector<1x256xf32>
    %33 = vector.broadcast %32 : vector<1x256xf32> to vector<8x256xf32>
    %34 = arith.mulf %30, %33 : vector<8x256xf32>
    %35 = arith.truncf %34 : vector<8x256xf32> to vector<8x256xbf16>
    %c24 = arith.constant 24 : index
    %c0_21 = arith.constant 0 : index
    %36 = vector.load %arg12[%c24, %c0_21] : memref<200x256xbf16, #tpu.memory_space<vmem>>, vector<8x256xbf16>
    tpu.vector_store %arg12[%c24, %c0_21], %35 {strides = array<i32>} : memref<200x256xbf16, #tpu.memory_space<vmem>>, vector<8x256xbf16>,
    %c1_i32 = arith.constant 1 : i32
    %37 = tpu.dynamic_rotate %9 by %c1_i32 dim 1 : vector<8x256xf32>, i32 -> vector<8x256xf32>
    %c4 = arith.constant 4 : index
    %c0_22 = arith.constant 0 : index
    %c0_23 = arith.constant 0 : index
    %38 = vector.load %arg10[%c4, %c0_22, %c0_23] : memref<25x1x256xf32, #tpu.memory_space<vmem>>, vector<1x1x256xf32>
    %39 = vector.shape_cast %38 : vector<1x1x256xf32> to vector<1x256xf32>
    %40 = vector.broadcast %39 : vector<1x256xf32> to vector<8x256xf32>
    %41 = arith.mulf %37, %40 : vector<8x256xf32>
    %42 = arith.truncf %41 : vector<8x256xf32> to vector<8x256xbf16>
    %c32 = arith.constant 32 : index
    %c0_24 = arith.constant 0 : index
    %43 = vector.load %arg12[%c32, %c0_24] : memref<200x256xbf16, #tpu.memory_space<vmem>>, vector<8x256xbf16>
    tpu.vector_store %arg12[%c32, %c0_24], %42 {strides = array<i32>} : memref<200x256xbf16, #tpu.memory_space<vmem>>, vector<8x256xbf16>,
    %c255_i32 = arith.constant 255 : i32
    %44 = tpu.dynamic_rotate %9 by %c255_i32 dim 1 : vector<8x256xf32>, i32 -> vector<8x256xf32>
    %c5 = arith.constant 5 : index
    %c0_25 = arith.constant 0 : index
    %c0_26 = arith.constant 0 : index
    %45 = vector.load %arg10[%c5, %c0_25, %c0_26] : memref<25x1x256xf32, #tpu.memory_space<vmem>>, vector<1x1x256xf32>
    %46 = vector.shape_cast %45 : vector<1x1x256xf32> to vector<1x256xf32>
    %47 = vector.broadcast %46 : vector<1x256xf32> to vector<8x256xf32>
    %48 = arith.mulf %44, %47 : vector<8x256xf32>
    %49 = arith.truncf %48 : vector<8x256xf32> to vector<8x256xbf16>
    %c40 = arith.constant 40 : index
    %c0_27 = arith.constant 0 : index
    %50 = vector.load %arg12[%c40, %c0_27] : memref<200x256xbf16, #tpu.memory_space<vmem>>, vector<8x256xbf16>
    tpu.vector_store %arg12[%c40, %c0_27], %49 {strides = array<i32>} : memref<200x256xbf16, #tpu.memory_space<vmem>>, vector<8x256xbf16>,
    %c241_i32 = arith.constant 241 : i32
    %51 = tpu.dynamic_rotate %9 by %c241_i32 dim 1 : vector<8x256xf32>, i32 -> vector<8x256xf32>
    %c6 = arith.constant 6 : index
    %c0_28 = arith.constant 0 : index
    %c0_29 = arith.constant 0 : index
    %52 = vector.load %arg10[%c6, %c0_28, %c0_29] : memref<25x1x256xf32, #tpu.memory_space<vmem>>, vector<1x1x256xf32>
    %53 = vector.shape_cast %52 : vector<1x1x256xf32> to vector<1x256xf32>
    %54 = vector.broadcast %53 : vector<1x256xf32> to vector<8x256xf32>
    %55 = arith.mulf %51, %54 : vector<8x256xf32>
    %56 = arith.truncf %55 : vector<8x256xf32> to vector<8x256xbf16>
    %c48 = arith.constant 48 : index
    %c0_30 = arith.constant 0 : index
    %57 = vector.load %arg12[%c48, %c0_30] : memref<200x256xbf16, #tpu.memory_space<vmem>>, vector<8x256xbf16>
    tpu.vector_store %arg12[%c48, %c0_30], %56 {strides = array<i32>} : memref<200x256xbf16, #tpu.memory_space<vmem>>, vector<8x256xbf16>,
    %c240_i32 = arith.constant 240 : i32
    %58 = tpu.dynamic_rotate %9 by %c240_i32 dim 1 : vector<8x256xf32>, i32 -> vector<8x256xf32>
    %c7 = arith.constant 7 : index
    %c0_31 = arith.constant 0 : index
    %c0_32 = arith.constant 0 : index
    %59 = vector.load %arg10[%c7, %c0_31, %c0_32] : memref<25x1x256xf32, #tpu.memory_space<vmem>>, vector<1x1x256xf32>
    %60 = vector.shape_cast %59 : vector<1x1x256xf32> to vector<1x256xf32>
    %61 = vector.broadcast %60 : vector<1x256xf32> to vector<8x256xf32>
    %62 = arith.mulf %58, %61 : vector<8x256xf32>
    %63 = arith.truncf %62 : vector<8x256xf32> to vector<8x256xbf16>
    %c56 = arith.constant 56 : index
    %c0_33 = arith.constant 0 : index
    %64 = vector.load %arg12[%c56, %c0_33] : memref<200x256xbf16, #tpu.memory_space<vmem>>, vector<8x256xbf16>
    tpu.vector_store %arg12[%c56, %c0_33], %63 {strides = array<i32>} : memref<200x256xbf16, #tpu.memory_space<vmem>>, vector<8x256xbf16>,
    %c239_i32 = arith.constant 239 : i32
    %65 = tpu.dynamic_rotate %9 by %c239_i32 dim 1 : vector<8x256xf32>, i32 -> vector<8x256xf32>
    %c8_34 = arith.constant 8 : index
    %c0_35 = arith.constant 0 : index
    %c0_36 = arith.constant 0 : index
    %66 = vector.load %arg10[%c8_34, %c0_35, %c0_36] : memref<25x1x256xf32, #tpu.memory_space<vmem>>, vector<1x1x256xf32>
    %67 = vector.shape_cast %66 : vector<1x1x256xf32> to vector<1x256xf32>
    %68 = vector.broadcast %67 : vector<1x256xf32> to vector<8x256xf32>
    %69 = arith.mulf %65, %68 : vector<8x256xf32>
    %70 = arith.truncf %69 : vector<8x256xf32> to vector<8x256xbf16>
    %c64 = arith.constant 64 : index
    %c0_37 = arith.constant 0 : index
    %71 = vector.load %arg12[%c64, %c0_37] : memref<200x256xbf16, #tpu.memory_space<vmem>>, vector<8x256xbf16>
    tpu.vector_store %arg12[%c64, %c0_37], %70 {strides = array<i32>} : memref<200x256xbf16, #tpu.memory_space<vmem>>, vector<8x256xbf16>,
    %c34_i32 = arith.constant 34 : i32
    %72 = tpu.dynamic_rotate %9 by %c34_i32 dim 1 : vector<8x256xf32>, i32 -> vector<8x256xf32>
    %c9 = arith.constant 9 : index
    %c0_38 = arith.constant 0 : index
    %c0_39 = arith.constant 0 : index
    %73 = vector.load %arg10[%c9, %c0_38, %c0_39] : memref<25x1x256xf32, #tpu.memory_space<vmem>>, vector<1x1x256xf32>
    %74 = vector.shape_cast %73 : vector<1x1x256xf32> to vector<1x256xf32>
    %75 = vector.broadcast %74 : vector<1x256xf32> to vector<8x256xf32>
    %76 = arith.mulf %72, %75 : vector<8x256xf32>
    %77 = arith.truncf %76 : vector<8x256xf32> to vector<8x256xbf16>
    %c72 = arith.constant 72 : index
    %c0_40 = arith.constant 0 : index
    %78 = vector.load %arg12[%c72, %c0_40] : memref<200x256xbf16, #tpu.memory_space<vmem>>, vector<8x256xbf16>
    tpu.vector_store %arg12[%c72, %c0_40], %77 {strides = array<i32>} : memref<200x256xbf16, #tpu.memory_space<vmem>>, vector<8x256xbf16>,
    %c33_i32 = arith.constant 33 : i32
    %79 = tpu.dynamic_rotate %9 by %c33_i32 dim 1 : vector<8x256xf32>, i32 -> vector<8x256xf32>
    %c10 = arith.constant 10 : index
    %c0_41 = arith.constant 0 : index
    %c0_42 = arith.constant 0 : index
    %80 = vector.load %arg10[%c10, %c0_41, %c0_42] : memref<25x1x256xf32, #tpu.memory_space<vmem>>, vector<1x1x256xf32>
    %81 = vector.shape_cast %80 : vector<1x1x256xf32> to vector<1x256xf32>
    %82 = vector.broadcast %81 : vector<1x256xf32> to vector<8x256xf32>
    %83 = arith.mulf %79, %82 : vector<8x256xf32>
    %84 = arith.truncf %83 : vector<8x256xf32> to vector<8x256xbf16>
    %c80 = arith.constant 80 : index
    %c0_43 = arith.constant 0 : index
    %85 = vector.load %arg12[%c80, %c0_43] : memref<200x256xbf16, #tpu.memory_space<vmem>>, vector<8x256xbf16>
    tpu.vector_store %arg12[%c80, %c0_43], %84 {strides = array<i32>} : memref<200x256xbf16, #tpu.memory_space<vmem>>, vector<8x256xbf16>,
    %c32_i32 = arith.constant 32 : i32
    %86 = tpu.dynamic_rotate %9 by %c32_i32 dim 1 : vector<8x256xf32>, i32 -> vector<8x256xf32>
    %c11 = arith.constant 11 : index
    %c0_44 = arith.constant 0 : index
    %c0_45 = arith.constant 0 : index
    %87 = vector.load %arg10[%c11, %c0_44, %c0_45] : memref<25x1x256xf32, #tpu.memory_space<vmem>>, vector<1x1x256xf32>
    %88 = vector.shape_cast %87 : vector<1x1x256xf32> to vector<1x256xf32>
    %89 = vector.broadcast %88 : vector<1x256xf32> to vector<8x256xf32>
    %90 = arith.mulf %86, %89 : vector<8x256xf32>
    %91 = arith.truncf %90 : vector<8x256xf32> to vector<8x256xbf16>
    %c88 = arith.constant 88 : index
    %c0_46 = arith.constant 0 : index
    %92 = vector.load %arg12[%c88, %c0_46] : memref<200x256xbf16, #tpu.memory_space<vmem>>, vector<8x256xbf16>
    tpu.vector_store %arg12[%c88, %c0_46], %91 {strides = array<i32>} : memref<200x256xbf16, #tpu.memory_space<vmem>>, vector<8x256xbf16>,
    %c31_i32 = arith.constant 31 : i32
    %93 = tpu.dynamic_rotate %9 by %c31_i32 dim 1 : vector<8x256xf32>, i32 -> vector<8x256xf32>
    %c12 = arith.constant 12 : index
    %c0_47 = arith.constant 0 : index
    %c0_48 = arith.constant 0 : index
    %94 = vector.load %arg10[%c12, %c0_47, %c0_48] : memref<25x1x256xf32, #tpu.memory_space<vmem>>, vector<1x1x256xf32>
    %95 = vector.shape_cast %94 : vector<1x1x256xf32> to vector<1x256xf32>
    %96 = vector.broadcast %95 : vector<1x256xf32> to vector<8x256xf32>
    %97 = arith.mulf %93, %96 : vector<8x256xf32>
    %98 = arith.truncf %97 : vector<8x256xf32> to vector<8x256xbf16>
    %c96 = arith.constant 96 : index
    %c0_49 = arith.constant 0 : index
    %99 = vector.load %arg12[%c96, %c0_49] : memref<200x256xbf16, #tpu.memory_space<vmem>>, vector<8x256xbf16>
    tpu.vector_store %arg12[%c96, %c0_49], %98 {strides = array<i32>} : memref<200x256xbf16, #tpu.memory_space<vmem>>, vector<8x256xbf16>,
    %c30_i32 = arith.constant 30 : i32
    %100 = tpu.dynamic_rotate %9 by %c30_i32 dim 1 : vector<8x256xf32>, i32 -> vector<8x256xf32>
    %c13 = arith.constant 13 : index
    %c0_50 = arith.constant 0 : index
    %c0_51 = arith.constant 0 : index
    %101 = vector.load %arg10[%c13, %c0_50, %c0_51] : memref<25x1x256xf32, #tpu.memory_space<vmem>>, vector<1x1x256xf32>
    %102 = vector.shape_cast %101 : vector<1x1x256xf32> to vector<1x256xf32>
    %103 = vector.broadcast %102 : vector<1x256xf32> to vector<8x256xf32>
    %104 = arith.mulf %100, %103 : vector<8x256xf32>
    %105 = arith.truncf %104 : vector<8x256xf32> to vector<8x256xbf16>
    %c104 = arith.constant 104 : index
    %c0_52 = arith.constant 0 : index
    %106 = vector.load %arg12[%c104, %c0_52] : memref<200x256xbf16, #tpu.memory_space<vmem>>, vector<8x256xbf16>
    tpu.vector_store %arg12[%c104, %c0_52], %105 {strides = array<i32>} : memref<200x256xbf16, #tpu.memory_space<vmem>>, vector<8x256xbf16>,
    %c18_i32 = arith.constant 18 : i32
    %107 = tpu.dynamic_rotate %9 by %c18_i32 dim 1 : vector<8x256xf32>, i32 -> vector<8x256xf32>
    %c14 = arith.constant 14 : index
    %c0_53 = arith.constant 0 : index
    %c0_54 = arith.constant 0 : index
    %108 = vector.load %arg10[%c14, %c0_53, %c0_54] : memref<25x1x256xf32, #tpu.memory_space<vmem>>, vector<1x1x256xf32>
    %109 = vector.shape_cast %108 : vector<1x1x256xf32> to vector<1x256xf32>
    %110 = vector.broadcast %109 : vector<1x256xf32> to vector<8x256xf32>
    %111 = arith.mulf %107, %110 : vector<8x256xf32>
    %112 = arith.truncf %111 : vector<8x256xf32> to vector<8x256xbf16>
    %c112 = arith.constant 112 : index
    %c0_55 = arith.constant 0 : index
    %113 = vector.load %arg12[%c112, %c0_55] : memref<200x256xbf16, #tpu.memory_space<vmem>>, vector<8x256xbf16>
    tpu.vector_store %arg12[%c112, %c0_55], %112 {strides = array<i32>} : memref<200x256xbf16, #tpu.memory_space<vmem>>, vector<8x256xbf16>,
    %c14_i32 = arith.constant 14 : i32
    %114 = tpu.dynamic_rotate %9 by %c14_i32 dim 1 : vector<8x256xf32>, i32 -> vector<8x256xf32>
    %c15 = arith.constant 15 : index
    %c0_56 = arith.constant 0 : index
    %c0_57 = arith.constant 0 : index
    %115 = vector.load %arg10[%c15, %c0_56, %c0_57] : memref<25x1x256xf32, #tpu.memory_space<vmem>>, vector<1x1x256xf32>
    %116 = vector.shape_cast %115 : vector<1x1x256xf32> to vector<1x256xf32>
    %117 = vector.broadcast %116 : vector<1x256xf32> to vector<8x256xf32>
    %118 = arith.mulf %114, %117 : vector<8x256xf32>
    %119 = arith.truncf %118 : vector<8x256xf32> to vector<8x256xbf16>
    %c120 = arith.constant 120 : index
    %c0_58 = arith.constant 0 : index
    %120 = vector.load %arg12[%c120, %c0_58] : memref<200x256xbf16, #tpu.memory_space<vmem>>, vector<8x256xbf16>
    tpu.vector_store %arg12[%c120, %c0_58], %119 {strides = array<i32>} : memref<200x256xbf16, #tpu.memory_space<vmem>>, vector<8x256xbf16>,
    %c2_i32 = arith.constant 2 : i32
    %121 = tpu.dynamic_rotate %9 by %c2_i32 dim 1 : vector<8x256xf32>, i32 -> vector<8x256xf32>
    %c16_59 = arith.constant 16 : index
    %c0_60 = arith.constant 0 : index
    %c0_61 = arith.constant 0 : index
    %122 = vector.load %arg10[%c16_59, %c0_60, %c0_61] : memref<25x1x256xf32, #tpu.memory_space<vmem>>, vector<1x1x256xf32>
    %123 = vector.shape_cast %122 : vector<1x1x256xf32> to vector<1x256xf32>
    %124 = vector.broadcast %123 : vector<1x256xf32> to vector<8x256xf32>
    %125 = arith.mulf %121, %124 : vector<8x256xf32>
    %126 = arith.truncf %125 : vector<8x256xf32> to vector<8x256xbf16>
    %c128 = arith.constant 128 : index
    %c0_62 = arith.constant 0 : index
    %127 = vector.load %arg12[%c128, %c0_62] : memref<200x256xbf16, #tpu.memory_space<vmem>>, vector<8x256xbf16>
    tpu.vector_store %arg12[%c128, %c0_62], %126 {strides = array<i32>} : memref<200x256xbf16, #tpu.memory_space<vmem>>, vector<8x256xbf16>,
    %c254_i32 = arith.constant 254 : i32
    %128 = tpu.dynamic_rotate %9 by %c254_i32 dim 1 : vector<8x256xf32>, i32 -> vector<8x256xf32>
    %c17 = arith.constant 17 : index
    %c0_63 = arith.constant 0 : index
    %c0_64 = arith.constant 0 : index
    %129 = vector.load %arg10[%c17, %c0_63, %c0_64] : memref<25x1x256xf32, #tpu.memory_space<vmem>>, vector<1x1x256xf32>
    %130 = vector.shape_cast %129 : vector<1x1x256xf32> to vector<1x256xf32>
    %131 = vector.broadcast %130 : vector<1x256xf32> to vector<8x256xf32>
    %132 = arith.mulf %128, %131 : vector<8x256xf32>
    %133 = arith.truncf %132 : vector<8x256xf32> to vector<8x256xbf16>
    %c136 = arith.constant 136 : index
    %c0_65 = arith.constant 0 : index
    %134 = vector.load %arg12[%c136, %c0_65] : memref<200x256xbf16, #tpu.memory_space<vmem>>, vector<8x256xbf16>
    tpu.vector_store %arg12[%c136, %c0_65], %133 {strides = array<i32>} : memref<200x256xbf16, #tpu.memory_space<vmem>>, vector<8x256xbf16>,
    %c242_i32 = arith.constant 242 : i32
    %135 = tpu.dynamic_rotate %9 by %c242_i32 dim 1 : vector<8x256xf32>, i32 -> vector<8x256xf32>
    %c18 = arith.constant 18 : index
    %c0_66 = arith.constant 0 : index
    %c0_67 = arith.constant 0 : index
    %136 = vector.load %arg10[%c18, %c0_66, %c0_67] : memref<25x1x256xf32, #tpu.memory_space<vmem>>, vector<1x1x256xf32>
    %137 = vector.shape_cast %136 : vector<1x1x256xf32> to vector<1x256xf32>
    %138 = vector.broadcast %137 : vector<1x256xf32> to vector<8x256xf32>
    %139 = arith.mulf %135, %138 : vector<8x256xf32>
    %140 = arith.truncf %139 : vector<8x256xf32> to vector<8x256xbf16>
    %c144 = arith.constant 144 : index
    %c0_68 = arith.constant 0 : index
    %141 = vector.load %arg12[%c144, %c0_68] : memref<200x256xbf16, #tpu.memory_space<vmem>>, vector<8x256xbf16>
    tpu.vector_store %arg12[%c144, %c0_68], %140 {strides = array<i32>} : memref<200x256xbf16, #tpu.memory_space<vmem>>, vector<8x256xbf16>,
    %c238_i32 = arith.constant 238 : i32
    %142 = tpu.dynamic_rotate %9 by %c238_i32 dim 1 : vector<8x256xf32>, i32 -> vector<8x256xf32>
    %c19 = arith.constant 19 : index
    %c0_69 = arith.constant 0 : index
    %c0_70 = arith.constant 0 : index
    %143 = vector.load %arg10[%c19, %c0_69, %c0_70] : memref<25x1x256xf32, #tpu.memory_space<vmem>>, vector<1x1x256xf32>
    %144 = vector.shape_cast %143 : vector<1x1x256xf32> to vector<1x256xf32>
    %145 = vector.broadcast %144 : vector<1x256xf32> to vector<8x256xf32>
    %146 = arith.mulf %142, %145 : vector<8x256xf32>
    %147 = arith.truncf %146 : vector<8x256xf32> to vector<8x256xbf16>
    %c152 = arith.constant 152 : index
    %c0_71 = arith.constant 0 : index
    %148 = vector.load %arg12[%c152, %c0_71] : memref<200x256xbf16, #tpu.memory_space<vmem>>, vector<8x256xbf16>
    tpu.vector_store %arg12[%c152, %c0_71], %147 {strides = array<i32>} : memref<200x256xbf16, #tpu.memory_space<vmem>>, vector<8x256xbf16>,
    %c226_i32 = arith.constant 226 : i32
    %149 = tpu.dynamic_rotate %9 by %c226_i32 dim 1 : vector<8x256xf32>, i32 -> vector<8x256xf32>
    %c20 = arith.constant 20 : index
    %c0_72 = arith.constant 0 : index
    %c0_73 = arith.constant 0 : index
    %150 = vector.load %arg10[%c20, %c0_72, %c0_73] : memref<25x1x256xf32, #tpu.memory_space<vmem>>, vector<1x1x256xf32>
    %151 = vector.shape_cast %150 : vector<1x1x256xf32> to vector<1x256xf32>
    %152 = vector.broadcast %151 : vector<1x256xf32> to vector<8x256xf32>
    %153 = arith.mulf %149, %152 : vector<8x256xf32>
    %154 = arith.truncf %153 : vector<8x256xf32> to vector<8x256xbf16>
    %c160 = arith.constant 160 : index
    %c0_74 = arith.constant 0 : index
    %155 = vector.load %arg12[%c160, %c0_74] : memref<200x256xbf16, #tpu.memory_space<vmem>>, vector<8x256xbf16>
    tpu.vector_store %arg12[%c160, %c0_74], %154 {strides = array<i32>} : memref<200x256xbf16, #tpu.memory_space<vmem>>, vector<8x256xbf16>,
    %c225_i32 = arith.constant 225 : i32
    %156 = tpu.dynamic_rotate %9 by %c225_i32 dim 1 : vector<8x256xf32>, i32 -> vector<8x256xf32>
    %c21 = arith.constant 21 : index
    %c0_75 = arith.constant 0 : index
    %c0_76 = arith.constant 0 : index
    %157 = vector.load %arg10[%c21, %c0_75, %c0_76] : memref<25x1x256xf32, #tpu.memory_space<vmem>>, vector<1x1x256xf32>
    %158 = vector.shape_cast %157 : vector<1x1x256xf32> to vector<1x256xf32>
    %159 = vector.broadcast %158 : vector<1x256xf32> to vector<8x256xf32>
    %160 = arith.mulf %156, %159 : vector<8x256xf32>
    %161 = arith.truncf %160 : vector<8x256xf32> to vector<8x256xbf16>
    %c168 = arith.constant 168 : index
    %c0_77 = arith.constant 0 : index
    %162 = vector.load %arg12[%c168, %c0_77] : memref<200x256xbf16, #tpu.memory_space<vmem>>, vector<8x256xbf16>
    tpu.vector_store %arg12[%c168, %c0_77], %161 {strides = array<i32>} : memref<200x256xbf16, #tpu.memory_space<vmem>>, vector<8x256xbf16>,
    %c224_i32 = arith.constant 224 : i32
    %163 = tpu.dynamic_rotate %9 by %c224_i32 dim 1 : vector<8x256xf32>, i32 -> vector<8x256xf32>
    %c22 = arith.constant 22 : index
    %c0_78 = arith.constant 0 : index
    %c0_79 = arith.constant 0 : index
    %164 = vector.load %arg10[%c22, %c0_78, %c0_79] : memref<25x1x256xf32, #tpu.memory_space<vmem>>, vector<1x1x256xf32>
    %165 = vector.shape_cast %164 : vector<1x1x256xf32> to vector<1x256xf32>
    %166 = vector.broadcast %165 : vector<1x256xf32> to vector<8x256xf32>
    %167 = arith.mulf %163, %166 : vector<8x256xf32>
    %168 = arith.truncf %167 : vector<8x256xf32> to vector<8x256xbf16>
    %c176 = arith.constant 176 : index
    %c0_80 = arith.constant 0 : index
    %169 = vector.load %arg12[%c176, %c0_80] : memref<200x256xbf16, #tpu.memory_space<vmem>>, vector<8x256xbf16>
    tpu.vector_store %arg12[%c176, %c0_80], %168 {strides = array<i32>} : memref<200x256xbf16, #tpu.memory_space<vmem>>, vector<8x256xbf16>,
    %c223_i32 = arith.constant 223 : i32
    %170 = tpu.dynamic_rotate %9 by %c223_i32 dim 1 : vector<8x256xf32>, i32 -> vector<8x256xf32>
    %c23 = arith.constant 23 : index
    %c0_81 = arith.constant 0 : index
    %c0_82 = arith.constant 0 : index
    %171 = vector.load %arg10[%c23, %c0_81, %c0_82] : memref<25x1x256xf32, #tpu.memory_space<vmem>>, vector<1x1x256xf32>
    %172 = vector.shape_cast %171 : vector<1x1x256xf32> to vector<1x256xf32>
    %173 = vector.broadcast %172 : vector<1x256xf32> to vector<8x256xf32>
    %174 = arith.mulf %170, %173 : vector<8x256xf32>
    %175 = arith.truncf %174 : vector<8x256xf32> to vector<8x256xbf16>
    %c184 = arith.constant 184 : index
    %c0_83 = arith.constant 0 : index
    %176 = vector.load %arg12[%c184, %c0_83] : memref<200x256xbf16, #tpu.memory_space<vmem>>, vector<8x256xbf16>
    tpu.vector_store %arg12[%c184, %c0_83], %175 {strides = array<i32>} : memref<200x256xbf16, #tpu.memory_space<vmem>>, vector<8x256xbf16>,
    %c222_i32 = arith.constant 222 : i32
    %177 = tpu.dynamic_rotate %9 by %c222_i32 dim 1 : vector<8x256xf32>, i32 -> vector<8x256xf32>
    %c24_84 = arith.constant 24 : index
    %c0_85 = arith.constant 0 : index
    %c0_86 = arith.constant 0 : index
    %178 = vector.load %arg10[%c24_84, %c0_85, %c0_86] : memref<25x1x256xf32, #tpu.memory_space<vmem>>, vector<1x1x256xf32>
    %179 = vector.shape_cast %178 : vector<1x1x256xf32> to vector<1x256xf32>
    %180 = vector.broadcast %179 : vector<1x256xf32> to vector<8x256xf32>
    %181 = arith.mulf %177, %180 : vector<8x256xf32>
    %182 = arith.truncf %181 : vector<8x256xf32> to vector<8x256xbf16>
    %c192 = arith.constant 192 : index
    %c0_87 = arith.constant 0 : index
    %183 = vector.load %arg12[%c192, %c0_87] : memref<200x256xbf16, #tpu.memory_space<vmem>>, vector<8x256xbf16>
    tpu.vector_store %arg12[%c192, %c0_87], %182 {strides = array<i32>} : memref<200x256xbf16, #tpu.memory_space<vmem>>, vector<8x256xbf16>,
    %c0_88 = arith.constant 0 : index
    %c0_89 = arith.constant 0 : index
    %c0_90 = arith.constant 0 : index
    %184 = vector.load %arg7[%c0_88, %c0_89, %c0_90] : memref<1x32x1xf32, #tpu.memory_space<vmem>>, vector<1x32x1xf32>
    %185 = vector.shape_cast %184 : vector<1x32x1xf32> to vector<32x1xf32>
    %c0_91 = arith.constant 0 : index
    %c0_92 = arith.constant 0 : index
    %c0_93 = arith.constant 0 : index
    %186 = vector.load %arg8[%c0_91, %c0_92, %c0_93] : memref<1x32x1xf32, #tpu.memory_space<vmem>>, vector<1x32x1xf32>
    %187 = vector.shape_cast %186 : vector<1x32x1xf32> to vector<32x1xf32>
    %c0_94 = arith.constant 0 : index
    %c0_95 = arith.constant 0 : index
    %c0_96 = arith.constant 0 : index
    %188 = vector.load %arg9[%c0_94, %c0_95, %c0_96] : memref<1x32x1xf32, #tpu.memory_space<vmem>>, vector<1x32x1xf32>
    %189 = vector.shape_cast %188 : vector<1x32x1xf32> to vector<32x1xf32>
    %c0_97 = arith.constant 0 : index
    %c0_98 = arith.constant 0 : index
    %c0_99 = arith.constant 0 : index
    %190 = vector.load %arg5[%c0_97, %c0_98, %c0_99] : memref<1x16x72xbf16, #tpu.memory_space<vmem>>, vector<1x16x72xbf16>
    %191 = vector.shape_cast %190 : vector<1x16x72xbf16> to vector<16x72xbf16>
    %c0_100 = arith.constant 0 : index
    %c0_101 = arith.constant 0 : index
    %192 = vector.load %arg12[%c0_100, %c0_101] : memref<200x256xbf16, #tpu.memory_space<vmem>>, vector<72x256xbf16>
    %cst_102 = arith.constant dense<0.000000e+00> : vector<16x256xf32>
    %193 = tpu.matmul %191, %192, %cst_102 {dimension_numbers = #tpu.dot_dimension_numbers<[1], [0], [0], [1], [0, 0, 1, 1], [], []>} : vector<16x72xbf16>, vector<72x256xbf16>, vector<16x256xf32> -> vector<16x256xf32>
    %194 = vector.extract_strided_slice %185 {offsets = [0, 0], sizes = [16, 1], strides = [1, 1]} : vector<32x1xf32> to vector<16x1xf32>
    %195 = vector.broadcast %194 : vector<16x1xf32> to vector<16x256xf32>
    %196 = arith.addf %193, %195 : vector<16x256xf32>
    %cst_103 = arith.constant dense<0.000000e+00> : vector<16xf32>
    %197 = vector.multi_reduction <add>, %196, %cst_103 [1] : vector<16x256xf32> to vector<16xf32>
    %198 = vector.shape_cast %197 : vector<16xf32> to vector<16x1xf32>
    %cst_104 = arith.constant dense<0.000000e+00> : vector<1xf32>
    %199 = vector.multi_reduction <add>, %198, %cst_104 [0] : vector<16x1xf32> to vector<1xf32>
    %200 = vector.shape_cast %199 : vector<1xf32> to vector<1x1xf32>
    %cst_105 = arith.constant 2.44140625E-4 : f32
    %201 = vector.broadcast %cst_105 : f32 to vector<1x1xf32>
    %202 = arith.mulf %200, %201 : vector<1x1xf32>
    %203 = vector.broadcast %202 : vector<1x1xf32> to vector<16x256xf32>
    %204 = arith.subf %196, %203 : vector<16x256xf32>
    %205 = arith.mulf %204, %204 : vector<16x256xf32>
    %cst_106 = arith.constant dense<0.000000e+00> : vector<16xf32>
    %206 = vector.multi_reduction <add>, %205, %cst_106 [1] : vector<16x256xf32> to vector<16xf32>
    %207 = vector.shape_cast %206 : vector<16xf32> to vector<16x1xf32>
    %cst_107 = arith.constant dense<0.000000e+00> : vector<1xf32>
    %208 = vector.multi_reduction <add>, %207, %cst_107 [0] : vector<16x1xf32> to vector<1xf32>
    %209 = vector.shape_cast %208 : vector<1xf32> to vector<1x1xf32>
    %cst_108 = arith.constant 2.44140625E-4 : f32
    %210 = vector.broadcast %cst_108 : f32 to vector<1x1xf32>
    %211 = arith.mulf %209, %210 : vector<1x1xf32>
    %cst_109 = arith.constant 9.99999974E-6 : f32
    %212 = vector.broadcast %cst_109 : f32 to vector<1x1xf32>
    %213 = arith.addf %211, %212 : vector<1x1xf32>
    %214 = math.rsqrt %213 : vector<1x1xf32>
    %215 = vector.extract_strided_slice %187 {offsets = [0, 0], sizes = [16, 1], strides = [1, 1]} : vector<32x1xf32> to vector<16x1xf32>
    %216 = vector.broadcast %214 : vector<1x1xf32> to vector<16x1xf32>
    %217 = arith.mulf %216, %215 : vector<16x1xf32>
    %218 = vector.broadcast %217 : vector<16x1xf32> to vector<16x256xf32>
    %219 = arith.mulf %204, %218 : vector<16x256xf32>
    %220 = vector.extract_strided_slice %189 {offsets = [0, 0], sizes = [16, 1], strides = [1, 1]} : vector<32x1xf32> to vector<16x1xf32>
    %221 = vector.broadcast %220 : vector<16x1xf32> to vector<16x256xf32>
    %222 = arith.addf %219, %221 : vector<16x256xf32>
    %cst_110 = arith.constant 0.000000e+00 : f32
    %223 = vector.broadcast %cst_110 : f32 to vector<16x256xf32>
    %224 = arith.cmpf ogt, %222, %223 : vector<16x256xf32>
    %cst_111 = arith.constant 2.000000e-01 : f32
    %225 = vector.broadcast %cst_111 : f32 to vector<16x256xf32>
    %226 = arith.mulf %225, %222 : vector<16x256xf32>
    %227 = arith.select %224, %222, %226 : vector<16x256xi1>, vector<16x256xf32>
    %c0_112 = arith.constant 0 : index
    %c0_113 = arith.constant 0 : index
    %c0_114 = arith.constant 0 : index
    %228 = vector.load %arg6[%c0_112, %c0_113, %c0_114] : memref<1x16x200xbf16, #tpu.memory_space<vmem>>, vector<1x16x200xbf16>
    %229 = vector.shape_cast %228 : vector<1x16x200xbf16> to vector<16x200xbf16>
    %c0_115 = arith.constant 0 : index
    %c0_116 = arith.constant 0 : index
    %230 = vector.load %arg12[%c0_115, %c0_116] : memref<200x256xbf16, #tpu.memory_space<vmem>>, vector<200x256xbf16>
    %cst_117 = arith.constant dense<0.000000e+00> : vector<16x256xf32>
    %231 = tpu.matmul %229, %230, %cst_117 {dimension_numbers = #tpu.dot_dimension_numbers<[1], [0], [0], [1], [0, 0, 1, 1], [], []>} : vector<16x200xbf16>, vector<200x256xbf16>, vector<16x256xf32> -> vector<16x256xf32>
    %232 = vector.extract_strided_slice %185 {offsets = [16, 0], sizes = [16, 1], strides = [1, 1]} : vector<32x1xf32> to vector<16x1xf32>
    %233 = vector.broadcast %232 : vector<16x1xf32> to vector<16x256xf32>
    %234 = arith.addf %231, %233 : vector<16x256xf32>
    %cst_118 = arith.constant dense<0.000000e+00> : vector<16xf32>
    %235 = vector.multi_reduction <add>, %234, %cst_118 [1] : vector<16x256xf32> to vector<16xf32>
    %236 = vector.shape_cast %235 : vector<16xf32> to vector<16x1xf32>
    %cst_119 = arith.constant dense<0.000000e+00> : vector<1xf32>
    %237 = vector.multi_reduction <add>, %236, %cst_119 [0] : vector<16x1xf32> to vector<1xf32>
    %238 = vector.shape_cast %237 : vector<1xf32> to vector<1x1xf32>
    %cst_120 = arith.constant 2.44140625E-4 : f32
    %239 = vector.broadcast %cst_120 : f32 to vector<1x1xf32>
    %240 = arith.mulf %238, %239 : vector<1x1xf32>
    %241 = vector.broadcast %240 : vector<1x1xf32> to vector<16x256xf32>
    %242 = arith.subf %234, %241 : vector<16x256xf32>
    %243 = arith.mulf %242, %242 : vector<16x256xf32>
    %cst_121 = arith.constant dense<0.000000e+00> : vector<16xf32>
    %244 = vector.multi_reduction <add>, %243, %cst_121 [1] : vector<16x256xf32> to vector<16xf32>
    %245 = vector.shape_cast %244 : vector<16xf32> to vector<16x1xf32>
    %cst_122 = arith.constant dense<0.000000e+00> : vector<1xf32>
    %246 = vector.multi_reduction <add>, %245, %cst_122 [0] : vector<16x1xf32> to vector<1xf32>
    %247 = vector.shape_cast %246 : vector<1xf32> to vector<1x1xf32>
    %cst_123 = arith.constant 2.44140625E-4 : f32
    %248 = vector.broadcast %cst_123 : f32 to vector<1x1xf32>
    %249 = arith.mulf %247, %248 : vector<1x1xf32>
    %cst_124 = arith.constant 9.99999974E-6 : f32
    %250 = vector.broadcast %cst_124 : f32 to vector<1x1xf32>
    %251 = arith.addf %249, %250 : vector<1x1xf32>
    %252 = math.rsqrt %251 : vector<1x1xf32>
    %253 = vector.extract_strided_slice %187 {offsets = [16, 0], sizes = [16, 1], strides = [1, 1]} : vector<32x1xf32> to vector<16x1xf32>
    %254 = vector.broadcast %252 : vector<1x1xf32> to vector<16x1xf32>
    %255 = arith.mulf %254, %253 : vector<16x1xf32>
    %256 = vector.broadcast %255 : vector<16x1xf32> to vector<16x256xf32>
    %257 = arith.mulf %242, %256 : vector<16x256xf32>
    %258 = vector.extract_strided_slice %189 {offsets = [16, 0], sizes = [16, 1], strides = [1, 1]} : vector<32x1xf32> to vector<16x1xf32>
    %259 = vector.broadcast %258 : vector<16x1xf32> to vector<16x256xf32>
    %260 = arith.addf %257, %259 : vector<16x256xf32>
    %cst_125 = arith.constant 0.000000e+00 : f32
    %261 = vector.broadcast %cst_125 : f32 to vector<16x256xf32>
    %262 = arith.cmpf ogt, %260, %261 : vector<16x256xf32>
    %cst_126 = arith.constant 2.000000e-01 : f32
    %263 = vector.broadcast %cst_126 : f32 to vector<16x256xf32>
    %264 = arith.mulf %263, %260 : vector<16x256xf32>
    %265 = arith.select %262, %260, %264 : vector<16x256xi1>, vector<16x256xf32>
    %266 = arith.addf %227, %265 : vector<16x256xf32>
    %c0_127 = arith.constant 0 : index
    %c0_128 = arith.constant 0 : index
    %c0_129 = arith.constant 0 : index
    %267 = vector.load %arg11[%c0_127, %c0_128, %c0_129] : memref<1x16x256xf32, #tpu.memory_space<vmem>>, vector<1x16x256xf32>
    %268 = vector.shape_cast %267 : vector<1x16x256xf32> to vector<16x256xf32>
    %269 = vector.shape_cast %266 : vector<16x256xf32> to vector<1x16x256xf32>
    tpu.vector_store %arg11[%c0_127, %c0_128, %c0_129], %269 {strides = array<i32>} : memref<1x16x256xf32, #tpu.memory_space<vmem>>, vector<1x16x256xf32>,
    return
  }
  func.func @transform_0(%arg0: i32, %arg1: i32) -> (i32, i32, i32) {
    %c0_i32 = arith.constant 0 : i32
    %c0_i32_0 = arith.constant 0 : i32
    %c0_i32_1 = arith.constant 0 : i32
    return %arg0, %c0_i32, %c0_i32_0 : i32, i32, i32
  }
  func.func @transform_1(%arg0: i32, %arg1: i32) -> (i32, i32, i32) {
    %c0_i32 = arith.constant 0 : i32
    %c0_i32_0 = arith.constant 0 : i32
    %c0_i32_1 = arith.constant 0 : i32
    return %arg1, %c0_i32, %c0_i32_0 : i32, i32, i32
  }
  func.func @transform_2(%arg0: i32, %arg1: i32) -> (i32, i32, i32) {
    %c0_i32 = arith.constant 0 : i32
    %c0_i32_0 = arith.constant 0 : i32
    %c0_i32_1 = arith.constant 0 : i32
    return %arg1, %c0_i32, %c0_i32_0 : i32, i32, i32
  }
  func.func @transform_3(%arg0: i32, %arg1: i32) -> (i32, i32, i32) {
    %c0_i32 = arith.constant 0 : i32
    %c0_i32_0 = arith.constant 0 : i32
    %c0_i32_1 = arith.constant 0 : i32
    return %arg1, %c0_i32, %c0_i32_0 : i32, i32, i32
  }
  func.func @transform_4(%arg0: i32, %arg1: i32) -> (i32, i32, i32) {
    %c0_i32 = arith.constant 0 : i32
    %c0_i32_0 = arith.constant 0 : i32
    %c0_i32_1 = arith.constant 0 : i32
    return %arg1, %c0_i32, %c0_i32_0 : i32, i32, i32
  }
  func.func @transform_5(%arg0: i32, %arg1: i32) -> (i32, i32, i32) {
    %c0_i32 = arith.constant 0 : i32
    %c0_i32_0 = arith.constant 0 : i32
    %c0_i32_1 = arith.constant 0 : i32
    return %arg1, %c0_i32, %c0_i32_0 : i32, i32, i32
  }
  func.func @transform_6(%arg0: i32, %arg1: i32) -> (i32, i32, i32) {
    %c0_i32 = arith.constant 0 : i32
    %c0_i32_0 = arith.constant 0 : i32
    %c0_i32_1 = arith.constant 0 : i32
    return %arg1, %c0_i32, %c0_i32_0 : i32, i32, i32
  }
  func.func @transform_7(%arg0: i32, %arg1: i32) -> (i32, i32, i32) {
    %c0_i32 = arith.constant 0 : i32
    %c0_i32_0 = arith.constant 0 : i32
    %c0_i32_1 = arith.constant 0 : i32
    return %arg1, %c0_i32, %c0_i32_0 : i32, i32, i32
  }
  func.func @transform_8(%arg0: i32, %arg1: i32) -> (i32, i32, i32) {
    %c0_i32 = arith.constant 0 : i32
    %c0_i32_0 = arith.constant 0 : i32
    %c0_i32_1 = arith.constant 0 : i32
    %c0_i32_2 = arith.constant 0 : i32
    return %c0_i32, %c0_i32_0, %c0_i32_1 : i32, i32, i32
  }
  func.func @transform_9(%arg0: i32, %arg1: i32) -> (i32, i32, i32) {
    %c0_i32 = arith.constant 0 : i32
    %c0_i32_0 = arith.constant 0 : i32
    return %arg0, %arg1, %c0_i32 : i32, i32, i32
  }
}

</mosaic_0001>

<bundles_post_ra>
// kernel: tpu_custom_call.1
= control target key start
LH: loop header
LB: loop body
LE: loop exit
PB: predicated region body
PF: predicated region fallthrough
CT: control target
= control target key end

     0   :  { %s4290_s0 = inlined_call_operand.hbm [shape: f32[2,32,256], index: 0, kind: input, shape index: {}]   ;;  %s4291_s1 = inlined_call_operand.hbm [shape: bf16[4,8,32], index: 1, kind: input, shape index: {}]   ;;  %s4292_s2 = inlined_call_operand.hbm [shape: f32[4,8,1], index: 2, kind: input, shape index: {}]   ;;  %s4293_s3 = inlined_call_operand.hbm [shape: bf16[4,16,72], index: 3, kind: input, shape index: {}]   ;;  %s4294_s4 = inlined_call_operand.hbm [shape: bf16[4,16,200], index: 4, kind: input, shape index: {}]   ;;  %s4295_s5 = inlined_call_operand.hbm [shape: f32[4,32,1], index: 5, kind: input, shape index: {}]   ;;  %s4296_s6 = inlined_call_operand.hbm [shape: f32[4,32,1], index: 6, kind: input, shape index: {}]   ;;  %s4297_s7 = inlined_call_operand.hbm [shape: f32[4,32,1], index: 7, kind: input, shape index: {}]   ;;  %s4298_s8 = inlined_call_operand.hbm [shape: f32[25,1,256], index: 8, kind: input, shape index: {}]   ;;  %s4299_s9 = inlined_call_operand.hbm [shape: f32[2,64,256], index: 9, kind: output, shape index: {}]  }
   0x1   :  { %4339 = sst [smem:[#allocation41_spill]] %s4290_s0 }
   0x2   :  { %4340 = sst [smem:[#allocation42_spill]] %s4291_s1 }
   0x3   :  { %4341 = sst [smem:[#allocation43_spill]] %s4293_s3 }
   0x4   :  { %4342 = sst [smem:[#allocation44_spill]] %s4295_s5 }
   0x5   :  { %4343 = sst [smem:[#allocation45_spill]] %s4296_s6 }
   0x6   :  { %4344 = sst [smem:[#allocation46_spill]] %s4297_s7 }
   0x7   :  { %4345 = sst [smem:[#allocation47_spill]] %s4298_s8 }
   0x8   :  { %4346 = sst [smem:[#allocation48_spill]] %s4299_s9 }
   0x9   :  { %14 = vsyncpa [#allocation4], 0 }
   0xa   :  { %16 = vsyncpa [#allocation4 + $0x1], 0 }
   0xb   :  { %17 = vsyncpa [#allocation7], 0 }
   0xc   :  { %19 = vsyncpa [#allocation7 + $0x1], 0 }
   0xd   :  { %20 = vsyncpa [#allocation10], 0 }
   0xe   :  { %22 = vsyncpa [#allocation10 + $0x1], 0 }
   0xf   :  { %23 = vsyncpa [#allocation13], 0 }
  0x10   :  { %25 = vsyncpa [#allocation13 + $0x1], 0 }
  0x11   :  { %26 = vsyncpa [#allocation16], 0 }
  0x12   :  { %28 = vsyncpa [#allocation16 + $0x1], 0 }
  0x13   :  { %29 = vsyncpa [#allocation5], 0 }
  0x14   :  { %31 = vsyncpa [#allocation5 + $0x1], 0  ;;  %s3192_s30 = smov 0   ;;  %s3194_s10 = smov 0  }
  0x15   :  { %s3196_s11 = smov 0   ;;  %s3198_s12 = smov 0  }
  0x16   :  { %s3200_s13 = smov 0   ;;  %s3202_s14 = smov 0  }
  0x17   :  { %s3204_s15 = smov 0   ;;  %s3206_s16 = smov 0  }
  0x18   :  { %s3208_s17 = smov 0   ;;  %s3210_s18 = smov 0  }
  0x19   :  { %s3212_s19 = smov 0   ;;  %s3214_s20 = smov 0  }
  0x1a   :  { %s3216_s21 = smov 0   ;;  %s3218_s22 = smov 0  }
  0x1b LB: > { %4347 = sst [smem:[#allocation26_spill]] %s3044_s30  ;;  %s3259_s23 = sadd.s32 4294967295, %s3096_s22   ;;  %s3096_s22 = sphi %s3218_s22, %s37_s22   ;;  %s3092_s21 = sphi %s3216_s21, %s4426_s21   ;;  %s3088_s20 = sphi %s3214_s20, %s4425_s20   ;;  %s3084_s19 = sphi %s3212_s19, %s4424_s19   ;;  %s3080_s18 = sphi %s3210_s18, %s4423_s18   ;;  %s3076_s17 = sphi %s3208_s17, %s4422_s17   ;;  %s3072_s16 = sphi %s3206_s16, %s4421_s16   ;;  %s3068_s15 = sphi %s3204_s15, %s4417_s15   ;;  %s3064_s14 = sphi %s3202_s14, %s4416_s14   ;;  %s3060_s13 = sphi %s3200_s13, %s4415_s13   ;;  %s3056_s12 = sphi %s3198_s12, %s4414_s12   ;;  %s3052_s11 = sphi %s3196_s11, %s4420_s11   ;;  %s3048_s10 = sphi %s3194_s10, %s4419_s10   ;;  %s3044_s30 = sphi %s3192_s30, %s4413_s30  }
  0x1c   : > { %4348 = sst [smem:[#allocation27_spill]] %s3048_s10  ;;  %s2273_s24 = sadd.s32 4294967294, %s3096_s22  }
  0x1d   : > { %4349 = sst [smem:[#allocation28_spill]] %s3060_s13  ;;  %p69_p0 = scmp.ne.s32.totalorder %s3072_s16, %s3068_s15 }
  0x1e   : > { %4350 = sst [smem:[#allocation29_spill]] %s3064_s14  ;;  %p4307_p1 = scmp.eq.s32.totalorder %s3259_s23, 0 }
  0x1f   : > { %4351 = sst [smem:[#allocation30_spill]] %s3072_s16  ;;  %p95_p2 = scmp.ne.s32.totalorder %s3060_s13, %s3056_s12 }
  0x20   : > { %4352 = sst [smem:[#allocation31_spill]] %s3080_s18  ;;  %p297_p3 = scmp.ne.s32.totalorder %s3052_s11, %s3048_s10 }
  0x21   : > { %4353 = sst [smem:[#allocation32_spill]] %s3084_s19  ;;  %p3269_p4 = por %p4307_p1, %p69_p0 }
  0x22   : > { %4354 = sst [smem:[#allocation33_spill]] %s3259_s23  ;;  %p298_p5 = scmp.eq.s32.totalorder %s3259_s23, 7 }
  0x23   : > { %s4355_s25 = scalar_select %p3269_p4, 1, 0 }
  0x24   : > { %p3276_p6 = por %p95_p2, %p4307_p1  ;;  %p303_p7 = scmp.ne.s32.totalorder %s3048_s10, %s3044_s30 }
  0x25   : > { %4356 = sst [smem:[#allocation34_spill]] %s4355_s25  ;;  %p3282_p8 = por %p298_p5, %p297_p3 }
  0x26   : > { %s4357_s26 = scalar_select %p3276_p6, 1, 0 }
  0x27   : > { %s4359_s27 = scalar_select %p3282_p8, 1, 0 }
  0x28   : > { %4358 = sst [smem:[#allocation35_spill]] %s4357_s26  ;;  %p304_p9 = scmp.eq.s32.totalorder %s2273_s24, 7 }
  0x29   : > { %4360 = sst [smem:[#allocation36_spill]] %s4359_s27  ;;  %p2274_p10 = scmp.ge.s32.totalorder %s3096_s22, 1 }
  0x2a   : > { %p311_p11 = scmp.lt.s32.totalorder %s3096_s22, 9  ;;  %p3288_p12 = por %p304_p9, %p303_p7 }
  0x2b   : > { %s3098_s12 = smov [#allocation17]   ;;  %s4366_s8 = sld [smem:[#allocation47_spill]] }
  0x2c   : > { %s4361_s28 = scalar_select %p3288_p12, 1, 0 }
  0x2d   : > { %p3292_p13 = pnand %p2274_p10, %p311_p11  ;;  %s323_s15 = sshll.u32 %s3098_s12, 4  ;;  %s324_s15 = int_to_ptr.vmem [resolvable:$true] %s323_s15 }
  0x2e   : > { %4362 = sst [smem:[#allocation37_spill]] %s4361_s28 }
  0x2f   : > { %s4363_s29 = scalar_select %p3292_p13, 1, 0 }
  0x30   : > { %p2468_p0 = pneg %p3292_p13 }
  0x31   : > { %4364 = sst [smem:[#allocation38_spill]] %s4363_s29  ;;  %s2662_s28 = scalar_lea.hbm %s4366_s8, 800 }
  0x32   : > { %p3300_p2 = pnand %p2468_p0, %p4307_p1  ;;  %p2663_p3 = scmp.ne.s32.totalorder %s4366_s8, %s2662_s28 }
  0x33   : > { %p2669_p10 = scmp.lt.u32.totalorder %s2662_s28, %s4366_s8 }
  0x34   : > { %p2664_p5 = pneg %p3300_p2 }
  0x36   : > { %p2665_p7 = pnand %p2664_p5, %p2663_p3 }
  0x38   : > { %p2666_p9 = pneg %p2665_p7 }
  0x3a   : > { %p2671_p11 = pnand %p2669_p10, %p2666_p9 }
  0x3c   : > { %2674 = shalt.err (!%p2671_p11)
}
  0x3d   : > { %s2675_s10 = scalar_lea.vmem %s324_s15, 800  ;;  %p2683_p8 = scmp.lt.s32.totalorder %s324_s15, %s324_s15 }
  0x3e   : > { %p2676_p0 = scmp.ne.s32.totalorder %s324_s15, %s2675_s10  ;;  %p2684_p6 = scmp.lt.s32.totalorder %s2675_s10, %s2675_s10 }
  0x40   : > { %p2678_p1 = pnand %p2676_p0, %p2664_p5  ;;  %p2685_p4 = por %p2684_p6, %p2683_p8 }
  0x42   : > { %p2679_p12 = pneg %p2678_p1 }
  0x44   : > { %p2686_p13 = pnand %p2685_p4, %p2679_p12 }
  0x46   : > { %2689 = shalt.err (!%p2686_p13)
}
  0x47   : > { %s3099_s9 = smov 32   ;;  %s3100_s18 = smov 2  }
  0x48   : > { %2471 = dma.hbm_to_vmem [thread:$0]  (!%p3300_p2), %s4366_s8, 800, %s324_s15, [#allocation16], %s3099_s9, %s3099_s9, %s3100_s18  }
  0x49   : > { %s46_s27 = sadd.s32 1, %s3088_s20  ;;  %p4322_p1 = scmp.eq.s32.totalorder %s3096_s22, 0 }
  0x4a   : > { %p3322_p4 = scmp.ge.s32.totalorder %s46_s27, 4  ;;  %s82_s24 = sadd.s32 1, %s3064_s14 }
  0x4b   : > { %p89_p6 = scmp.ne.s32.totalorder %s3064_s14, %s3060_s13  ;;  %p4321_p8 = scmp.lt.s32.totalorder %s3096_s22, 8 }
  0x4c   : > { %s4367_s28 = scalar_select %p3322_p4, 1, 0 }
  0x4d   : > { %s4428_s27 = smov (%p3322_p4, %s46_s27), 0  ;;  %p91_p12 = por %p89_p6, %p4322_p1 }
  0x4e   : > { %4368 = sst [smem:[#allocation39_spill]] %s4428_s27  ;;  %s3337_s30 = sand.u32 1, %s3096_s22  }
  0x4f   : > { %s3341_s15 = ssub.s32 %s3088_s20, %s4428_s27  ;;  %s3345_s12 = sand.u32 1, %s3064_s14  }
  0x50   : > { %p80_p13 = scmp.eq.s32.totalorder %s3341_s15, 0  ;;  %s2280_s9 = sshll.u32 %s3345_s12, 2 }
  0x51   : > { %s2281_s18 = sshll.u32 %s3088_s20, 6  ;;  %s4370_s1 = sld [smem:[#allocation42_spill]] }
  0x52   : > { %s3350_s19 = scalar_select %p80_p13, %s3064_s14, %s82_s24  }
  0x53   : > { %s362_s27 = scalar_lea.vmem [#allocation6], %s2280_s9  ;;  %p3359_p2 = pnand %p4321_p8, %p91_p12 }
  0x54   : > { %4369 = sst [smem:[#allocation40_spill]] %s3350_s19  ;;  %s369_s13 = sshll.u32 %s362_s27, 4  ;;  %s3363_s13 = int_to_ptr.vmem [resolvable:$true] %s369_s13 }
  0x55   : > { %s4371_s23 = scalar_select %p3359_p2, 1, 0 }
  0x56   : > { %s4325_s19 = scalar_lea.sflag [#allocation7], %s3337_s30  ;;  %p3371_p5 = pneg %p3359_p2 }
  0x57   : > { %s3355_s26 = scalar_lea.hbm %s4370_s1, %s2281_s18  ;;  %s2695_s18 = scalar_lea.hbm %s4370_s1, 256 }
  0x58   : > { %s2690_s14 = scalar_lea.hbm %s3355_s26, 64  ;;  %p2696_p10 = scmp.lt.u32.totalorder %s3355_s26, %s4370_s1 }
  0x59   : > { %p2691_p3 = scmp.ne.s32.totalorder %s3355_s26, %s2690_s14  ;;  %p2697_p11 = scmp.lt.u32.totalorder %s2695_s18, %s2690_s14 }
  0x5a   : > { %p2699_p6 = scmp.lt.u32.totalorder %s2690_s14, %s3355_s26 }
  0x5b   : > { %p2693_p7 = pnand %p3371_p5, %p2691_p3  ;;  %p2698_p0 = por %p2697_p11, %p2696_p10 }
  0x5d   : > { %p2694_p9 = pneg %p2693_p7  ;;  %p2700_p12 = por %p2699_p6, %p2698_p0 }
  0x5f   : > { %p2701_p13 = pnand %p2700_p12, %p2694_p9 }
  0x61   : > { %2704 = shalt.err (!%p2701_p13)
}
  0x62   : > { %s2705_s24 = scalar_lea.vmem %s3363_s13, 64  ;;  %s3101_s27 = smov [#allocation6]  }
  0x63   : > { %p2706_p3 = scmp.ne.s32.totalorder %s3363_s13, %s2705_s24  ;;  %s2710_s9 = sshll.u32 %s3101_s27, 4  ;;  %s2711_s9 = int_to_ptr.vmem [resolvable:$false] %s2710_s9 }
  0x64   : > { %s2712_s25 = scalar_lea.vmem %s2711_s9, 128  ;;  %p2713_p1 = scmp.lt.s32.totalorder %s3363_s13, %s2711_s9 }
  0x65   : > { %p2708_p7 = pnand %p2706_p3, %p3371_p5  ;;  %p2714_p4 = scmp.lt.s32.totalorder %s2712_s25, %s2705_s24 }
  0x67   : > { %p2709_p8 = pneg %p2708_p7  ;;  %p2715_p10 = por %p2714_p4, %p2713_p1 }
  0x69   : > { %p2716_p11 = pnand %p2715_p10, %p2709_p8 }
  0x6b   : > { %2719 = shalt.err (!%p2716_p11)
}
  0x6c   : > { %2478 = dma.hbm_to_vmem [thread:$0]  (!%p3359_p2), %s3355_s26, 64, %s3363_s13, %s4325_s19  }
  0x6d   : > { %s4326_s14 = sshll.u32 %s3345_s12, 3  ;;  %s4327_s18 = sshll.u32 %s3088_s20, 7 }
  0x6e   : > { %s4373_s3 = sld [smem:[#allocation43_spill]]  ;;  %s398_s9 = scalar_lea.vmem [#allocation9], %s4326_s14 }
  0x6f   : > { %s405_s25 = sshll.u32 %s398_s9, 4  ;;  %s4328_s1 = scalar_lea.sflag [#allocation10], %s3337_s30  ;;  %s3407_s25 = int_to_ptr.vmem [resolvable:$true] %s405_s25 }
  0x74   : > { %s3403_s27 = scalar_lea.hbm %s4373_s3, %s4327_s18  ;;  %s2725_s24 = scalar_lea.hbm %s4373_s3, 512 }
  0x75   : > { %s2720_s29 = scalar_lea.hbm %s3403_s27, 128  ;;  %p2726_p9 = scmp.lt.u32.totalorder %s3403_s27, %s4373_s3 }
  0x76   : > { %p2721_p1 = scmp.ne.s32.totalorder %s3403_s27, %s2720_s29  ;;  %p2727_p0 = scmp.lt.u32.totalorder %s2725_s24, %s2720_s29 }
  0x77   : > { %p2729_p12 = scmp.lt.u32.totalorder %s2720_s29, %s3403_s27 }
  0x78   : > { %p2723_p4 = pnand %p2721_p1, %p3371_p5  ;;  %p2728_p6 = por %p2727_p0, %p2726_p9 }
  0x7a   : > { %p2724_p8 = pneg %p2723_p4  ;;  %p2730_p13 = por %p2729_p12, %p2728_p6 }
  0x7c   : > { %p2731_p3 = pnand %p2730_p13, %p2724_p8 }
  0x7e   : > { %2734 = shalt.err (!%p2731_p3)
}
  0x7f   : > { %s2735_s9 = scalar_lea.vmem %s3407_s25, 128  ;;  %s3102_s13 = smov [#allocation9]  }
  0x80   : > { %p2736_p7 = scmp.ne.s32.totalorder %s3407_s25, %s2735_s9  ;;  %s2740_s26 = sshll.u32 %s3102_s13, 4  ;;  %s2741_s26 = int_to_ptr.vmem [resolvable:$false] %s2740_s26 }
  0x81   : > { %s2742_s19 = scalar_lea.vmem %s2741_s26, 256  ;;  %p2743_p1 = scmp.lt.s32.totalorder %s3407_s25, %s2741_s26 }
  0x82   : > { %p2738_p10 = pnand %p2736_p7, %p3371_p5  ;;  %p2744_p4 = scmp.lt.s32.totalorder %s2742_s19, %s2735_s9 }
  0x84   : > { %p2739_p11 = pneg %p2738_p10  ;;  %p2745_p9 = por %p2744_p4, %p2743_p1 }
  0x86   : > { %p2746_p0 = pnand %p2745_p9, %p2739_p11 }
  0x88   : > { %2749 = shalt.err (!%p2746_p0)
}
  0x89   : > { %s3103_s29 = smov 64   ;;  %s3104_s24 = smov 4  }
  0x8a   : > { %2484 = dma.hbm_to_vmem [thread:$0]  (!%p3359_p2), %s3403_s27, 128, %s3407_s25, %s4328_s1, %s3103_s29, %s3103_s29, %s3104_s24  }
  0x8b   : > { %s3434_s10 = sshll.u32 %s3345_s12, 5  ;;  %s3437_s9 = sshll.u32 %s3088_s20, 9 }
  0x8c   : > { %s4374_s5 = sld [smem:[#allocation44_spill]]  ;;  %s440_s14 = scalar_lea.vmem [#allocation12], %s3434_s10 }
  0x8d   : > { %s447_s18 = sshll.u32 %s440_s14, 4  ;;  %s4329_s27 = scalar_lea.sflag [#allocation13], %s3337_s30  ;;  %s3446_s18 = int_to_ptr.vmem [resolvable:$true] %s447_s18 }
  0x92   : > { %s3443_s19 = scalar_lea.hbm %s4374_s5, %s3437_s9  ;;  %s2755_s13 = scalar_lea.hbm %s4374_s5, 2048 }
  0x93   : > { %s2750_s25 = scalar_lea.hbm %s3443_s19, 512  ;;  %p2756_p13 = scmp.lt.u32.totalorder %s3443_s19, %s4374_s5 }
  0x94   : > { %p2751_p8 = scmp.ne.s32.totalorder %s3443_s19, %s2750_s25  ;;  %p2757_p3 = scmp.lt.u32.totalorder %s2755_s13, %s2750_s25 }
  0x95   : > { %p2759_p10 = scmp.lt.u32.totalorder %s2750_s25, %s3443_s19 }
  0x96   : > { %p2753_p6 = pnand %p2751_p8, %p3371_p5  ;;  %p2758_p7 = por %p2757_p3, %p2756_p13 }
  0x98   : > { %p2754_p12 = pneg %p2753_p6  ;;  %p2760_p11 = por %p2759_p10, %p2758_p7 }
  0x9a   : > { %p2761_p1 = pnand %p2760_p11, %p2754_p12 }
  0x9c   : > { %2764 = shalt.err (!%p2761_p1)
}
  0x9d   : > { %s2765_s14 = scalar_lea.vmem %s3446_s18, 512  ;;  %s3105_s29 = smov [#allocation12]  }
  0x9e   : > { %p2766_p4 = scmp.ne.s32.totalorder %s3446_s18, %s2765_s14  ;;  %s2770_s24 = sshll.u32 %s3105_s29, 4  ;;  %s2771_s24 = int_to_ptr.vmem [resolvable:$false] %s2770_s24 }
  0x9f   : > { %s2772_s1 = scalar_lea.vmem %s2771_s24, 1024  ;;  %p2773_p8 = scmp.lt.s32.totalorder %s3446_s18, %s2771_s24 }
  0xa0   : > { %p2768_p9 = pnand %p2766_p4, %p3371_p5  ;;  %p2774_p6 = scmp.lt.s32.totalorder %s2772_s1, %s2765_s14 }
  0xa2   : > { %p2769_p0 = pneg %p2768_p9  ;;  %p2775_p13 = por %p2774_p6, %p2773_p8 }
  0xa4   : > { %p2776_p3 = pnand %p2775_p13, %p2769_p0 }
  0xa6   : > { %2779 = shalt.err (!%p2776_p3)
}
  0xa7   : > { %s4330_s25 = smov 128   ;;  %s4332_s13 = smov 8  }
  0xa8   : > { %2490 = dma.hbm_to_vmem [thread:$0]  (!%p3359_p2), %s3443_s19, 512, %s3446_s18, %s4329_s27, %s4330_s25, %s4330_s25, %s4332_s13  }
  0xa9   : > { %s49_s26 = sadd.s32 1, %s3092_s21  ;;  %s56_s14 = sadd.s32 1, %s3076_s17 }
  0xaa   : > { %p4375_p12 = scmp.ne.s32.totalorder %s4367_s28, 0  ;;  %p63_p7 = scmp.ne.s32.totalorder %s3076_s17, %s3072_s16 }
  0xab   : > { %s287_s29 = sadd.s32 1, %s3052_s11  ;;  %s337_s24 = sand.u32 1, %s3076_s17  }
  0xac   : > { %s4430_s26 = smov (!%p4375_p12, %s49_s26), %s3092_s21  ;;  %p4376_p11 = scmp.eq.s32.totalorder %s3096_s22, 0 }
  0xad   : > { %p51_p10 = scmp.ge.s32.totalorder %s4430_s26, 2  ;;  %s2277_s18 = sshll.u32 %s337_s24, 6 }
  0xae   : > { %p3486_p1 = por %p4376_p11, %p63_p7  ;;  %s2386_s19 = sshll.u32 %s3092_s21, 10 }
  0xaf   : > { %s4432_s26 = smov (%p51_p10, %s4430_s26), 0  ;;  %s4378_s0 = sld [smem:[#allocation41_spill]] }
  0xb0   : > { %s53_s27 = ssub.s32 %s3092_s21, %s4432_s26  ;;  %s341_s7 = scalar_lea.vmem [#allocation3], %s2277_s18 }
  0xb1   : > { %p54_p4 = scmp.eq.s32.totalorder %s53_s27, 0  ;;  %s284_s28 = sor.u32 %s3341_s15, %s53_s27 }
  0xb2   : > { %p285_p9 = scmp.eq.s32.totalorder %s284_s28, 0  ;;  %s348_s6 = sshll.u32 %s341_s7, 4  ;;  %s3515_s6 = int_to_ptr.vmem [resolvable:$true] %s348_s6 }
  0xb3   : > { %s3502_s5 = scalar_select %p54_p4, %s3076_s17, %s56_s14  }
  0xb4   : > { %s3505_s16 = scalar_select %p285_p9, %s3052_s11, %s287_s29  }
  0xb5   : > { %s3499_s3 = scalar_lea.hbm %s4378_s0, %s2386_s19  ;;  %p4379_p0 = scmp.lt.s32.totalorder %s3096_s22, 8 }
  0xb6   : > { %s3517_s27 = scalar_lea.sflag [#allocation4], %s337_s24  ;;  %s2780_s25 = scalar_lea.hbm %s3499_s3, 1024 }
  0xb7   : > { %p3511_p8 = pnand %p4379_p0, %p3486_p1  ;;  %p2781_p6 = scmp.ne.s32.totalorder %s3499_s3, %s2780_s25 }
  0xb8   : > { %s2785_s14 = scalar_lea.hbm %s4378_s0, 2048  ;;  %p2786_p7 = scmp.lt.u32.totalorder %s3499_s3, %s4378_s0 }
  0xb9   : > { %p2782_p13 = pneg %p3511_p8  ;;  %p2787_p10 = scmp.lt.u32.totalorder %s2785_s14, %s2780_s25 }
  0xba   : > { %p2789_p1 = scmp.lt.u32.totalorder %s2780_s25, %s3499_s3 }
  0xbb   : > { %p2783_p3 = pnand %p2782_p13, %p2781_p6  ;;  %p2788_p11 = por %p2787_p10, %p2786_p7 }
  0xbd   : > { %p2784_p12 = pneg %p2783_p3  ;;  %p2790_p4 = por %p2789_p1, %p2788_p11 }
  0xbf   : > { %p2791_p9 = pnand %p2790_p4, %p2784_p12 }
  0xc1   : > { %2794 = shalt.err (!%p2791_p9)
}
  0xc2   : > { %s2795_s24 = scalar_lea.vmem %s3515_s6, 1024  ;;  %s3108_s18 = smov [#allocation3]  }
  0xc3   : > { %p2796_p0 = scmp.ne.s32.totalorder %s3515_s6, %s2795_s24  ;;  %s2800_s19 = sshll.u32 %s3108_s18, 4  ;;  %s2801_s19 = int_to_ptr.vmem [resolvable:$false] %s2800_s19 }
  0xc4   : > { %s2802_s28 = scalar_lea.vmem %s2801_s19, 2048  ;;  %p2803_p2 = scmp.lt.s32.totalorder %s3515_s6, %s2801_s19 }
  0xc5   : > { %p2798_p6 = pnand %p2796_p0, %p2782_p13  ;;  %p2804_p7 = scmp.lt.s32.totalorder %s2802_s28, %s2795_s24 }
  0xc7   : > { %p2799_p3 = pneg %p2798_p6  ;;  %p2805_p10 = por %p2804_p7, %p2803_p2 }
  0xc9   : > { %p2806_p11 = pnand %p2805_p10, %p2799_p3 }
  0xcb   : > { %2809 = shalt.err (!%p2806_p11)
}
  0xcc   : > { %s3109_s25 = smov 256   ;;  %s3110_s7 = smov 16  }
  0xcd   : > { %2475 = dma.hbm_to_vmem [thread:$0]  (!%p3511_p8), %s3499_s3, 1024, %s3515_s6, %s3517_s27, %s3109_s25, %s3109_s25, %s3110_s7  }
  0xce   : > { %s4381_s13 = sshll.u32 %s3088_s20, 7  ;;  %s4382_s24 = sshll.u32 %s3345_s12, 3 }
  0xcf   : > { %s3550_s1 = scalar_lea.hbm %s4292_s2, %s4381_s13  ;;  %s380_s18 = scalar_lea.vmem [#allocation8], %s4382_s24 }
  0xd0   : > { %s387_s19 = sshll.u32 %s380_s18, 4  ;;  %s2388_s28 = sshll.u32 %s3088_s20, 8  ;;  %s388_s19 = int_to_ptr.vmem [resolvable:$true] %s387_s19 }
  0xd1   : > { %s2810_s0 = scalar_lea.hbm %s3550_s1, 128  ;;  %s2815_s15 = scalar_lea.hbm %s4292_s2, 512 }
  0xd2   : > { %p2811_p2 = scmp.ne.s32.totalorder %s3550_s1, %s2810_s0  ;;  %p2816_p12 = scmp.lt.u32.totalorder %s3550_s1, %s4292_s2 }
  0xd3   : > { %p2817_p1 = scmp.lt.u32.totalorder %s2815_s15, %s2810_s0  ;;  %p2819_p9 = scmp.lt.u32.totalorder %s2810_s0, %s3550_s1 }
  0xd4   : > { %p2813_p13 = pnand %p2811_p2, %p3371_p5 }
  0xd5   : > { %p2818_p4 = por %p2817_p1, %p2816_p12 }
  0xd6   : > { %p2814_p8 = pneg %p2813_p13 }
  0xd7   : > { %p2820_p0 = por %p2819_p9, %p2818_p4 }
  0xd9   : > { %p2821_p6 = pnand %p2820_p0, %p2814_p8 }
  0xdb   : > { %2824 = shalt.err (!%p2821_p6)
}
  0xdc   : > { %s2825_s7 = scalar_lea.vmem %s388_s19, 128  ;;  %s3111_s13 = smov [#allocation8]  }
  0xdd   : > { %p2826_p3 = scmp.ne.s32.totalorder %s388_s19, %s2825_s7  ;;  %s2830_s14 = sshll.u32 %s3111_s13, 4  ;;  %s2831_s14 = int_to_ptr.vmem [resolvable:$false] %s2830_s14 }
  0xde   : > { %s2832_s29 = scalar_lea.vmem %s2831_s14, 256  ;;  %p2833_p11 = scmp.lt.s32.totalorder %s388_s19, %s2831_s14 }
  0xdf   : > { %p2828_p7 = pnand %p2826_p3, %p3371_p5  ;;  %p2834_p2 = scmp.lt.s32.totalorder %s2832_s29, %s2825_s7 }
  0xe1   : > { %p2829_p10 = pneg %p2828_p7  ;;  %p2835_p13 = por %p2834_p2, %p2833_p11 }
  0xe3   : > { %p2836_p1 = pnand %p2835_p13, %p2829_p10 }
  0xe5   : > { %2839 = shalt.err (!%p2836_p1)
}
  0xe6   : > { %p4383_p12 = scmp.ne.s32.totalorder %s4371_s23, 0  ;;  %s4384_s0 = scalar_lea.sflag [#allocation7], %s3337_s30 }
  0xe7   : > { %s3577_s3 = scalar_lea.hbm %s4294_s4, %s2388_s28  ;;  %s4385_s6 = sshll.u32 %s3345_s12, 4 }
  0xe8   : > { %2481 = dma.hbm_to_vmem [thread:$0]  (!%p4383_p12), %s3550_s1, 128, %s388_s19, %s4384_s0  }
  0xe9   : > { %s419_s15 = scalar_lea.vmem [#allocation11], %s4385_s6  ;;  %s2840_s25 = scalar_lea.hbm %s3577_s3, 256 }
  0xea   : > { %s426_s27 = sshll.u32 %s419_s15, 4  ;;  %p2841_p8 = scmp.ne.s32.totalorder %s3577_s3, %s2840_s25  ;;  %s3581_s27 = int_to_ptr.vmem [resolvable:$true] %s426_s27 }
  0xeb   : > { %s2845_s7 = scalar_lea.hbm %s4294_s4, 1024  ;;  %p2846_p0 = scmp.lt.u32.totalorder %s3577_s3, %s4294_s4 }
  0xec   : > { %p2843_p4 = pnand %p2841_p8, %p3371_p5  ;;  %p2847_p6 = scmp.lt.u32.totalorder %s2845_s7, %s2840_s25 }
  0xed   : > { %p2849_p7 = scmp.lt.u32.totalorder %s2840_s25, %s3577_s3 }
  0xee   : > { %p2844_p9 = pneg %p2843_p4  ;;  %p2848_p3 = por %p2847_p6, %p2846_p0 }
  0xf0   : > { %p2850_p10 = por %p2849_p7, %p2848_p3 }
  0xf2   : > { %p2851_p11 = pnand %p2850_p10, %p2844_p9 }
  0xf4   : > { %2854 = shalt.err (!%p2851_p11)
}
  0xf5   : > { %s2855_s12 = scalar_lea.vmem %s3581_s27, 256  ;;  %s3112_s14 = smov [#allocation11]  }
  0xf6   : > { %p2856_p2 = scmp.ne.s32.totalorder %s3581_s27, %s2855_s12  ;;  %s2860_s29 = sshll.u32 %s3112_s14, 4  ;;  %s2861_s29 = int_to_ptr.vmem [resolvable:$false] %s2860_s29 }
  0xf7   : > { %s2862_s0 = scalar_lea.vmem %s2861_s29, 512  ;;  %p2863_p8 = scmp.lt.s32.totalorder %s3581_s27, %s2861_s29 }
  0xf8   : > { %p2858_p13 = pnand %p2856_p2, %p3371_p5  ;;  %p2864_p4 = scmp.lt.s32.totalorder %s2862_s0, %s2855_s12 }
  0xfa   : > { %p2859_p1 = pneg %p2858_p13  ;;  %p2865_p0 = por %p2864_p4, %p2863_p8 }
  0xfc   : > { %p2866_p6 = pnand %p2865_p0, %p2859_p1 }
  0xfe   : > { %2869 = shalt.err (!%p2866_p6)
}
  0xff   : > { %s4386_s24 = smov 8   ;;  %s4387_s18 = smov 128  }
 0x100   : > { %s4388_s6 = scalar_lea.sflag [#allocation10], %s3337_s30  ;;  %s4389_s1 = sld [smem:[#allocation45_spill]] }
 0x101   : > { %2487 = dma.hbm_to_vmem [thread:$0]  (!%p4383_p12), %s3577_s3, 256, %s3581_s27, %s4388_s6, %s4387_s18, %s4387_s18, %s4386_s24  }
 0x102   : > { %s461_s7 = scalar_lea.vmem [#allocation14], %s3434_s10 }
 0x103   : > { %s468_s28 = sshll.u32 %s461_s7, 4  ;;  %s3616_s28 = int_to_ptr.vmem [resolvable:$true] %s468_s28 }
 0x106   : > { %s3613_s19 = scalar_lea.hbm %s4389_s1, %s3437_s9  ;;  %s2875_s27 = scalar_lea.hbm %s4389_s1, 2048 }
 0x107   : > { %s2870_s13 = scalar_lea.hbm %s3613_s19, 512  ;;  %p2876_p10 = scmp.lt.u32.totalorder %s3613_s19, %s4389_s1 }
 0x108   : > { %p2871_p9 = scmp.ne.s32.totalorder %s3613_s19, %s2870_s13  ;;  %p2877_p11 = scmp.lt.u32.totalorder %s2875_s27, %s2870_s13 }
 0x109   : > { %p2879_p13 = scmp.lt.u32.totalorder %s2870_s13, %s3613_s19 }
 0x10a   : > { %p2873_p3 = pnand %p2871_p9, %p3371_p5  ;;  %p2878_p2 = por %p2877_p11, %p2876_p10 }
 0x10c   : > { %p2874_p7 = pneg %p2873_p3  ;;  %p2880_p1 = por %p2879_p13, %p2878_p2 }
 0x10e   : > { %p2881_p8 = pnand %p2880_p1, %p2874_p7 }
 0x110   : > { %2884 = shalt.err (!%p2881_p8)
}
 0x111   : > { %s2885_s0 = scalar_lea.vmem %s3616_s28, 512  ;;  %s3113_s6 = smov [#allocation14]  }
 0x112   : > { %p2886_p4 = scmp.ne.s32.totalorder %s3616_s28, %s2885_s0  ;;  %s2890_s15 = sshll.u32 %s3113_s6, 4  ;;  %s2891_s15 = int_to_ptr.vmem [resolvable:$false] %s2890_s15 }
 0x113   : > { %s2892_s25 = scalar_lea.vmem %s2891_s15, 1024  ;;  %p2893_p9 = scmp.lt.s32.totalorder %s3616_s28, %s2891_s15 }
 0x114   : > { %p2888_p0 = pnand %p2886_p4, %p3371_p5  ;;  %p2894_p3 = scmp.lt.s32.totalorder %s2892_s25, %s2885_s0 }
 0x116   : > { %p2889_p6 = pneg %p2888_p0  ;;  %p2895_p10 = por %p2894_p3, %p2893_p9 }
 0x118   : > { %p2896_p11 = pnand %p2895_p10, %p2889_p6 }
 0x11a   : > { %2899 = shalt.err (!%p2896_p11)
}
 0x11b   : > { %s4390_s7 = scalar_lea.sflag [#allocation13], %s3337_s30  ;;  %s4391_s3 = sld [smem:[#allocation46_spill]] }
 0x11c   : > { %2493 = dma.hbm_to_vmem [thread:$0]  (!%p4383_p12), %s3613_s19, 512, %s3616_s28, %s4390_s7, %s4387_s18, %s4387_s18, %s4386_s24  }
 0x11d   : > { %s482_s14 = scalar_lea.vmem [#allocation15], %s3434_s10  ;;  %s479_s0 = scalar_lea.sflag [#allocation16], %s3337_s30 }
 0x11e   : > { %s489_s29 = sshll.u32 %s482_s14, 4  ;;  %s3651_s29 = int_to_ptr.vmem [resolvable:$true] %s489_s29 }
 0x121   : > { %s3648_s27 = scalar_lea.hbm %s4391_s3, %s3437_s9  ;;  %s2905_s15 = scalar_lea.hbm %s4391_s3, 2048 }
 0x122   : > { %s2900_s6 = scalar_lea.hbm %s3648_s27, 512  ;;  %p2906_p1 = scmp.lt.u32.totalorder %s3648_s27, %s4391_s3 }
 0x123   : > { %p2901_p7 = scmp.ne.s32.totalorder %s3648_s27, %s2900_s6  ;;  %p2907_p8 = scmp.lt.u32.totalorder %s2905_s15, %s2900_s6 }
 0x124   : > { %p2909_p0 = scmp.lt.u32.totalorder %s2900_s6, %s3648_s27 }
 0x125   : > { %p2903_p2 = pnand %p2901_p7, %p3371_p5  ;;  %p2908_p4 = por %p2907_p8, %p2906_p1 }
 0x127   : > { %p2904_p13 = pneg %p2903_p2  ;;  %p2910_p6 = por %p2909_p0, %p2908_p4 }
 0x129   : > { %p2911_p9 = pnand %p2910_p6, %p2904_p13 }
 0x12b   : > { %2914 = shalt.err (!%p2911_p9)
}
 0x12c   : > { %s2915_s10 = scalar_lea.vmem %s3651_s29, 512  ;;  %s3114_s7 = smov [#allocation15]  }
 0x12d   : > { %p2916_p3 = scmp.ne.s32.totalorder %s3651_s29, %s2915_s10  ;;  %s2920_s13 = sshll.u32 %s3114_s7, 4  ;;  %s2921_s13 = int_to_ptr.vmem [resolvable:$false] %s2920_s13 }
 0x12e   : > { %s2922_s12 = scalar_lea.vmem %s2921_s13, 1024  ;;  %p2923_p7 = scmp.lt.s32.totalorder %s3651_s29, %s2921_s13 }
 0x12f   : > { %p2918_p10 = pnand %p2916_p3, %p3371_p5  ;;  %p2924_p2 = scmp.lt.s32.totalorder %s2922_s12, %s2915_s10 }
 0x131   : > { %p2919_p11 = pneg %p2918_p10  ;;  %p2925_p1 = por %p2924_p2, %p2923_p7 }
 0x133   : > { %p2926_p8 = pnand %p2925_p1, %p2919_p11 }
 0x135   : > { %2929 = shalt.err (!%p2926_p8)
}
 0x136   : > { %2496 = dma.hbm_to_vmem [thread:$0]  (!%p4383_p12), %s3648_s27, 512, %s3651_s29, %s479_s0, %s4387_s18, %s4387_s18, %s4386_s24  }
 0x137   : > { %s4392_s8 = sld [smem:[#allocation38_spill]] }
 0x13d   : > { %p4393_p5 = scmp.ne.s32.totalorder %s4392_s8, 0 }
 0x13e   : > { %s4394_s14 = sld [smem:[#allocation30_spill]] (!%p4393_p5)  ;;  %s4395_s6 = sld [smem:[#allocation34_spill]] (!%p4393_p5) }
 0x13f   : > { %501 = sbr.rel (%p4393_p5) target bundleno = 1504 (0x5e0), region = 56 }
 0x144   : > { %s503_s19 = sand.u32 (!%p4393_p5), 1, %s4394_s14   ;;  %p4396_p13 = scmp.ne.s32.totalorder (!%p4393_p5), %s4395_s6, 0 }
 0x145   : > { %s2300_s28 = sshll.u32 (!%p4393_p5), %s503_s19, 6  ;;  %s504_s15 = scalar_lea.sflag (!%p4393_p5), [#allocation4], %s503_s19 }
 0x146   : > { %s3683_s9 = scalar_lea.vmem [#allocation3], %s2300_s28 }
 0x147   : > { %3015 = dma.done.wait (%p4396_p13), %s504_s15, 1024  }
 0x148   : > { %3017 = vsyncadd (%p4396_p13), %s504_s15, 4294966272  ;;  %s4397_s23 = sld [smem:[#allocation33_spill]]  ;;  %s4399_s25 = sld [smem:[#allocation35_spill]] }
 0x149   : > { %s4398_s30 = sld [smem:[#allocation28_spill]] }
 0x14e   : > { %s512_s10 = sand.u32 1, %s4397_s23   ;;  %p4400_p12 = scmp.ne.s32.totalorder %s4399_s25, 0 }
 0x14f   : > { %s514_s24 = sand.u32 1, %s4398_s30   ;;  %s513_s27 = scalar_lea.sflag [#allocation7], %s512_s10 }
 0x150   : > { %s2301_s18 = sshll.u32 %s514_s24, 2 }
 0x151   : > { %s3691_s29 = scalar_lea.vmem [#allocation6], %s2301_s18 }
 0x152   : > { %3019 = dma.done.wait (%p4400_p12), %s513_s27, 192  }
 0x153   : > { %3021 = vsyncadd (%p4400_p12), %s513_s27, 4294967104  ;;  %s2302_s0 = sshll.u32 %s514_s24, 3  ;;  %s531_s13 = scalar_lea.sflag [#allocation10], %s512_s10 }
 0x154   : > { %s3697_s7 = scalar_lea.vmem [#allocation8], %s2302_s0  ;;  %s3699_s12 = scalar_lea.vmem [#allocation9], %s2302_s0 }
 0x155   : > { %3023 = dma.done.wait (%p4400_p12), %s531_s13, 384  }
 0x156   : > { %3025 = vsyncadd (%p4400_p12), %s531_s13, 4294966912  ;;  %s2304_s8 = sshll.u32 %s514_s24, 4  ;;  %s2305_s14 = sshll.u32 %s514_s24, 5 }
 0x157   : > { %s3705_s6 = scalar_lea.vmem [#allocation11], %s2304_s8  ;;  %s549_s19 = scalar_lea.sflag [#allocation13], %s512_s10 }
 0x158   : > { %s3707_s28 = scalar_lea.vmem [#allocation12], %s2305_s14 }
 0x159   : > { %3027 = dma.done.wait (%p4400_p12), %s549_s19, 1024  }
 0x15a   : > { %3029 = vsyncadd (%p4400_p12), %s549_s19, 4294966272  ;;  %s3713_s15 = scalar_lea.vmem [#allocation14], %s2305_s14  ;;  %s567_s30 = scalar_lea.sflag [#allocation16], %s512_s10 }
 0x15b   : > { %s3715_s18 = scalar_lea.vmem [#allocation15], %s2305_s14 }
 0x15c   : > { %3031 = dma.done.wait (%p4400_p12), %s567_s30, 512  }
 0x15d   : > { %3033 = vsyncadd (%p4400_p12), %s567_s30, 4294966784  ;;  %p4401_p4 = scmp.eq.s32.totalorder %s4397_s23, 0 }
 0x15f   : > { %3035 = dma.done.wait (%p4401_p4), [#allocation16], 800   ;;  %p4402_p0 = pmov %p4401_p4 }
 0x160   : > { %v3115_v0 = vmov 0   ;;  %v648_v1 = vld [vmem:[%s3683_s9 + $0x8] sm:$0xff]  ;;  %v650_v2 = vld [vmem:[%s3683_s9 + $0x18] sm:$0xff]  ;;  %v647_v3 = vld [vmem:[%s3683_s9] sm:$0xff]  ;;  %vm665_vm0 = vcmask 261120   ;;  %s3116_s23 = smov 16   ;;  %v712_v41 = vlaneseq }
 0x161   : > { %3037 = vsyncadd (%p4402_p0), [#allocation16], 4294966496  ;;  %701 = vmatprep.mubr.bf16.mxu1 %v3115_v0  ;;  %2652 = vset.pattern.permute.xlu0 %v3115_v0  ;;  %v656_v4 = vpack.c.bf16 %v650_v2, %v648_v1  ;;  %v649_v5 = vld [vmem:[%s3683_s9 + $0x10] sm:$0xff]  ;;  %v652_v6 = vld [vmem:[%s3683_s9 + $0x28] sm:$0xff]  ;;  %s3118_s25 = smov 15   ;;  %s3119_s10 = smov 1  }
 0x162   : > { %2653 = vset.pattern.permute.xlu1 %v3115_v0  ;;  %v654_v7 = vld [vmem:[%s3683_s9 + $0x38] sm:$0xff]  ;;  %v655_v8 = vpack.c.bf16 %v649_v5, %v647_v3  ;;  %v651_v10 = vld [vmem:[%s3683_s9 + $0x20] sm:$0xff]  ;;  %v653_v11 = vld [vmem:[%s3683_s9 + $0x30] sm:$0xff]  ;;  %s3117_s9 = smov 17   ;;  %s3120_s24 = smov 127   ;;  %vm1562_vm1 = vcmask 588800  }
 0x163   : > { %v658_v9 = vpack.c.bf16 %v654_v7, %v652_v6  ;;  %669 = vmatprep.subr.bf16.mxu1 %v656_v4  ;;  %v659_v12 = vld [vmem:[%s3697_s7] sm:$0xff]  ;;  %v657_v13 = vpack.c.bf16 %v653_v11, %v651_v10  ;;  %v646_v14 = vld [vmem:[%s3691_s29] sm:$0xf]  ;;  %s3121_s27 = smov 113   ;;  %s3122_s29 = smov 112   ;;  %v1481_v26 = vld [vmem:[%s3707_s28 + $0x10] sm:$0xff] }
 0x164   : > { %670 = vmatpush1.bf16.msra.mxu1 %v655_v8  ;;  %662 = vperm.xlu0 %2652, %v659_v12   ;;  %s3123_s0 = smov 111   ;;  %s3124_s7 = smov 34   ;;  %v2657_v22 = vld [vmem:[%s3705_s6 + $0x4] ss:$8 sps:$4 sm:$0xff]   ;;  %v713_v44 = vshrl.u32 %v712_v41, 7  ;;  %v3831_v49 = vand.u32 127, %v712_v41 }
 0x165   : > { %671 = vmatprep.subr.bf16.mxu1 %v658_v9  ;;  %s3125_s13 = smov 33   ;;  %s3126_s8 = smov 32   ;;  %2378 = vmatprep.mubr.msk.bf16.mxu0 %vm1562_vm1, %v2657_v22  ;;  %v1480_v23 = vld [vmem:[%s3707_s28 + $0x8] sm:$0xff]  ;;  %v1482_v24 = vld [vmem:[%s3707_s28 + $0x18] sm:$0xff]  ;;  %v1479_v25 = vld [vmem:[%s3707_s28] sm:$0xff]  ;;  %vm1566_vm15 = vcmask 1043456  }
 0x166   : > { %s3127_s14 = smov 31   ;;  %s3128_s19 = smov 30   ;;  %v3827_v47 = vsub.s32 0, %v713_v44  ;;  %v3829_v48 = vsub.s32 1, %v713_v44  ;;  %v710_v52 = vld [vmem:[#allocation17] sm:$0x3] }
 0x167   : > { %s3129_s30 = smov 18   ;;  %v3837_v53 = vld [vmem:[#allocation17 + $0x4] sm:$0x3]  ;;  %v805_v54 = vld [vmem:[#allocation17 + $0x6] sm:$0x3]  ;;  %vm770_vm2 = vcmp.lt.s32.totalorder %v3831_v49, 16 }
 0x168   : > { %672 = vmatpush1.bf16.msra.mxu1 %v657_v13  ;;  %v3839_v55 = vld [vmem:[#allocation17 + $0x8] sm:$0x3]  ;;  %v715_v56 = vrot.slane %v710_v52, %v3827_v47  ;;  %v743_v57 = vld [vmem:[#allocation17 + $0x2] sm:$0x3]  ;;  %v719_v58 = vrot.slane %v710_v52, %v3829_v48  ;;  %v779_v59 = vrot.slane %v3837_v53, %v3827_v47  ;;  %vm801_vm3 = vcmp.lt.s32.totalorder %v3831_v49, 15  ;;  %s4405_s28 = sld [smem:[#allocation32_spill]] }
 0x169   : > { %v783_v62 = vrot.slane %v3837_v53, %v3829_v48  ;;  %v810_v63 = vrot.slane %v805_v54, %v3827_v47  ;;  %vm832_vm4 = vcmp.lt.s32.totalorder %v3831_v49, 1  ;;  %v3856_v1 = vld [vmem:[#allocation17 + $0xa] sm:$0x3]  ;;  %v3858_v2 = vld [vmem:[#allocation17 + $0xc] sm:$0x3]  ;;  %v841_v3 = vrot.slane %v3839_v55, %v3827_v47 }
 0x16a   : > { %vm739_vm5 = vcmp.lt.s32.totalorder %v3831_v49, 17  ;;  %v748_v4 = vrot.slane %v743_v57, %v3827_v47  ;;  %v752_v5 = vrot.slane %v743_v57, %v3829_v48  ;;  %v845_v7 = vrot.slane %v3839_v55, %v3829_v48  ;;  %v3878_v13 = vld [vmem:[#allocation17 + $0xe] sm:$0x3]  ;;  %v3894_v22 = vld [vmem:[#allocation17 + $0x10] sm:$0x3] }
 0x16b   : > { %2310 = vmatmul.mubr.msk.bf16.vlgmr.msra.gmra.mrb[0].mxu1 %vm665_vm0, %v646_v14  ;;  %vm863_vm6 = vcmp.lt.s32.totalorder %v3831_v49, 127  ;;  %v872_v10 = vrot.slane %v3856_v1, %v3827_v47  ;;  %v876_v11 = vrot.slane %v3856_v1, %v3829_v48  ;;  %v903_v12 = vrot.slane %v3858_v2, %v3827_v47  ;;  %v3909_v41 = vld [vmem:[#allocation17 + $0x12] sm:$0x3] }
 0x16c   : > { %1605 = vmatprep.mubr.bf16.mxu1 %v3115_v0  ;;  %v814_v0 = vrot.slane %v805_v54, %v3829_v48  ;;  %vm925_vm7 = vcmp.lt.s32.totalorder %v3831_v49, 112  ;;  %vm894_vm8 = vcmp.lt.s32.totalorder %v3831_v49, 113  ;;  %vm956_vm9 = vcmp.lt.s32.totalorder %v3831_v49, 111 }
 0x16d   : > { %vm987_vm10 = vcmp.lt.s32.totalorder %v3831_v49, 34  ;;  %vm1018_vm11 = vcmp.lt.s32.totalorder %v3831_v49, 33  ;;  %vm1049_vm12 = vcmp.lt.s32.totalorder %v3831_v49, 32  ;;  %vm1080_vm13 = vcmp.lt.s32.totalorder %v3831_v49, 31 }
 0x16e   : > { %vm1111_vm14 = vcmp.lt.s32.totalorder %v3831_v49, 30  ;;  %vm1142_vm0 = vcmp.lt.s32.totalorder %v3831_v49, 18 }
 0x1e3   : > { %v663_v15 = vpop.permute.xlu0 %662 }
 0x23e   : > { %v703_v16 = vpop.f32.mrb[0].mxu1 }
 0x23f   : > { %v3735_v17 = vadd.f32 %v703_v16, %v663_v15  ;;  %v705_v18 = vpop.f32.mrb[1].mxu1 }
 0x240   : > { %v707_v19 = vpop.f32.mrb[2].mxu1  ;;  %v3741_v21 = vadd.f32 %v705_v18, %v663_v15 }
 0x241   : > { %v708_v20 = vpop.f32.mrb[3].mxu1  ;;  %766 = vrot.lane.b32.xlu1 %v3735_v17, %s3116_s23  ;;  %733 = vrot.lane.b32.xlu0 %v3735_v17, %s3117_s9  ;;  %v722_v8 = vmul.f32 %v715_v56, %v3735_v17 }
 0x242   : > { %v723_v9 = vmul.f32 %v719_v58, %v3741_v21  ;;  %v965_v58 = vrot.slane %v3894_v22, %v3827_v47 }
 0x245   : > { %797 = vrot.lane.b32.xlu1 %v3735_v17, %s3118_s25  ;;  %768 = vrot.lane.b32.xlu0 %v3741_v21, %s3116_s23 }
 0x249   : > { %828 = vrot.lane.b32.xlu1 %v3735_v17, %s3119_s10  ;;  %799 = vrot.lane.b32.xlu0 %v3741_v21, %s3118_s25  ;;  %s3130_s25 = smov 14  }
 0x24d   : > { %859 = vrot.lane.b32.xlu1 %v3735_v17, %s3120_s24  ;;  %830 = vrot.lane.b32.xlu0 %v3741_v21, %s3119_s10  ;;  %s3131_s10 = smov 2  }
 0x251   : > { %890 = vrot.lane.b32.xlu1 %v3735_v17, %s3121_s27  ;;  %861 = vrot.lane.b32.xlu0 %v3741_v21, %s3120_s24  ;;  %s3133_s24 = smov 114  }
 0x255   : > { %921 = vrot.lane.b32.xlu1 %v3735_v17, %s3122_s29  ;;  %892 = vrot.lane.b32.xlu0 %v3741_v21, %s3121_s27  ;;  %s3134_s27 = smov 110  }
 0x259   : > { %952 = vrot.lane.b32.xlu1 %v3735_v17, %s3123_s0  ;;  %923 = vrot.lane.b32.xlu0 %v3741_v21, %s3122_s29  ;;  %s3135_s29 = smov 98  }
 0x25d   : > { %983 = vrot.lane.b32.xlu1 %v3735_v17, %s3124_s7  ;;  %954 = vrot.lane.b32.xlu0 %v3741_v21, %s3123_s0  ;;  %s3136_s0 = smov 97  }
 0x261   : > { %1014 = vrot.lane.b32.xlu1 %v3735_v17, %s3125_s13  ;;  %985 = vrot.lane.b32.xlu0 %v3741_v21, %s3124_s7  ;;  %s3137_s7 = smov 96  }
 0x265   : > { %1045 = vrot.lane.b32.xlu1 %v3735_v17, %s3126_s8  ;;  %1016 = vrot.lane.b32.xlu0 %v3741_v21, %s3125_s13  ;;  %s3138_s13 = smov 95  }
 0x269   : > { %1076 = vrot.lane.b32.xlu1 %v3735_v17, %s3127_s14  ;;  %1047 = vrot.lane.b32.xlu0 %v3741_v21, %s3126_s8  ;;  %s3139_s8 = smov 94  }
 0x26d   : > { %735 = vrot.lane.b32.xlu1 %v3741_v21, %s3117_s9  ;;  %1078 = vrot.lane.b32.xlu0 %v3741_v21, %s3127_s14  ;;  %s3132_s9 = smov 126  }
 0x271   : > { %1107 = vrot.lane.b32.xlu1 %v3735_v17, %s3128_s19  ;;  %1109 = vrot.lane.b32.xlu0 %v3741_v21, %s3128_s19  ;;  %s2382_s19 = sshll.u32 %s4405_s28, 4 }
 0x275   : > { %1138 = vrot.lane.b32.xlu1 %v3735_v17, %s3129_s30  ;;  %1140 = vrot.lane.b32.xlu0 %v3741_v21, %s3129_s30 }
 0x279   : > { %1169 = vrot.lane.b32.xlu1 %v3735_v17, %s3130_s25  ;;  %1171 = vrot.lane.b32.xlu0 %v3741_v21, %s3130_s25 }
 0x27d   : > { %1200 = vrot.lane.b32.xlu1 %v3735_v17, %s3131_s10  ;;  %1202 = vrot.lane.b32.xlu0 %v3741_v21, %s3131_s10 }
 0x281   : > { %1231 = vrot.lane.b32.xlu1 %v3735_v17, %s3132_s9  ;;  %1233 = vrot.lane.b32.xlu0 %v3741_v21, %s3132_s9 }
 0x285   : > { %1262 = vrot.lane.b32.xlu1 %v3735_v17, %s3133_s24  ;;  %1264 = vrot.lane.b32.xlu0 %v3741_v21, %s3133_s24  ;;  %s4406_s24 = sld [smem:[#allocation36_spill]] }
 0x289   : > { %1293 = vrot.lane.b32.xlu1 %v3735_v17, %s3134_s27  ;;  %1295 = vrot.lane.b32.xlu0 %v3741_v21, %s3134_s27 }
 0x28b   : > { %p4408_p9 = scmp.ne.s32.totalorder %s4406_s24, 0 }
 0x28d   : > { %1324 = vrot.lane.b32.xlu1 %v3735_v17, %s3135_s29  ;;  %1326 = vrot.lane.b32.xlu0 %v3741_v21, %s3135_s29 }
 0x291   : > { %1355 = vrot.lane.b32.xlu1 %v3735_v17, %s3136_s0  ;;  %1357 = vrot.lane.b32.xlu0 %v3741_v21, %s3136_s0  ;;  %s4407_s0 = sld [smem:[#allocation48_spill]] }
 0x295   : > { %1386 = vrot.lane.b32.xlu1 %v3735_v17, %s3137_s7  ;;  %1388 = vrot.lane.b32.xlu0 %v3741_v21, %s3137_s7 }
 0x299   : > { %1417 = vrot.lane.b32.xlu1 %v3735_v17, %s3138_s13  ;;  %1419 = vrot.lane.b32.xlu0 %v3741_v21, %s3138_s13 }
 0x29d   : > { %1448 = vrot.lane.b32.xlu1 %v3735_v17, %s3139_s8  ;;  %1450 = vrot.lane.b32.xlu0 %v3741_v21, %s3139_s8  ;;  %v907_v17 = vrot.slane %v3858_v2, %v3829_v48 }
 0x2a1   : > { %1509 = vperm.xlu0 %2652, %v1480_v23   ;;  %1504 = vperm.xlu1 %2653, %v1479_v25  }
 0x2a5   : > { %1730 = vperm.xlu0 %2652, %v1482_v24   ;;  %1725 = vperm.xlu1 %2653, %v1481_v26   ;;  %v934_v26 = vrot.slane %v3878_v13, %v3827_v47 }
 0x2b3   : > { %v3797_v27 = vpop.permute.xlu1 %766  ;;  %v734_v28 = vpop.permute.xlu0 %733 }
 0x2b7   : > { %v798_v29 = vpop.permute.xlu1 %797  ;;  %v3799_v30 = vpop.permute.xlu0 %768 }
 0x2b8   : > { %v771_v16 = vsel %vm770_vm2, %v3797_v27, %v3799_v30 }
 0x2bb   : > { %v3801_v31 = vpop.permute.xlu1 %828  ;;  %v800_v32 = vpop.permute.xlu0 %799 }
 0x2bc   : > { %v802_v6 = vsel %vm801_vm3, %v798_v29, %v800_v32  ;;  %v803_v20 = vsel %vm801_vm3, %v800_v32, %v798_v29  ;;  %v772_v29 = vsel %vm770_vm2, %v3799_v30, %v3797_v27  ;;  %v787_v32 = vmul.f32 %v783_v62, %v771_v16 }
 0x2bd   : > { %v818_v21 = vmul.f32 %v814_v0, %v802_v6  ;;  %v817_v56 = vmul.f32 %v810_v63, %v803_v20  ;;  %v969_v27 = vrot.slane %v3894_v22, %v3829_v48  ;;  %v3928_v63 = vld [vmem:[#allocation17 + $0x14] sm:$0x3]  ;;  %v786_v1 = vmul.f32 %v779_v59, %v772_v29 }
 0x2be   : > { %v1000_v59 = vrot.slane %v3909_v41, %v3829_v48  ;;  %vm1173_vm2 = vcmp.lt.s32.totalorder %v3831_v49, 14  ;;  %vm1235_vm3 = vcmp.lt.s32.totalorder %v3831_v49, 126 }
 0x2bf   : > { %v3803_v33 = vpop.permute.xlu1 %859  ;;  %v3805_v34 = vpop.permute.xlu0 %830  ;;  %v2421_v0 = vpack.c.bf16 %v818_v21, %v787_v32 }
 0x2c0   : > { %v833_v57 = vsel %vm832_vm4, %v3801_v31, %v3805_v34 }
 0x2c3   : > { %v3807_v35 = vpop.permute.xlu1 %890  ;;  %v3809_v36 = vpop.permute.xlu0 %861 }
 0x2c4   : > { %v865_v25 = vsel %vm863_vm6, %v3809_v36, %v3803_v33  ;;  %v864_v30 = vsel %vm863_vm6, %v3803_v33, %v3809_v36  ;;  %v834_v33 = vsel %vm832_vm4, %v3805_v34, %v3801_v31  ;;  %v849_v36 = vmul.f32 %v845_v7, %v833_v57 }
 0x2c5   : > { %v880_v62 = vmul.f32 %v876_v11, %v865_v25  ;;  %v879_v11 = vmul.f32 %v872_v10, %v864_v30  ;;  %v1027_v31 = vrot.slane %v3928_v63, %v3827_v47  ;;  %v3962_v10 = vld [vmem:[#allocation17 + $0x16] sm:$0x3]  ;;  %v4024_v30 = vld [vmem:[#allocation17 + $0x1e] sm:$0x3]  ;;  %vm1204_vm4 = vcmp.lt.s32.totalorder %v3831_v49, 2 }
 0x2c6   : > { %v1058_v29 = vrot.slane %v3962_v10, %v3827_v47  ;;  %vm1328_vm6 = vcmp.lt.s32.totalorder %v3831_v49, 98 }
 0x2c7   : > { %v3811_v37 = vpop.permute.xlu1 %921  ;;  %v3813_v38 = vpop.permute.xlu0 %892  ;;  %v2423_v16 = vpack.c.bf16 %v880_v62, %v849_v36 }
 0x2cb   : > { %v3815_v39 = vpop.permute.xlu1 %952  ;;  %v3817_v40 = vpop.permute.xlu0 %923 }
 0x2cc   : > { %v926_v34 = vsel %vm925_vm7, %v3811_v37, %v3817_v40 }
 0x2cd   : > { %v941_v21 = vmul.f32 %v934_v26, %v926_v34 }
 0x2cf   : > { %v3819_v42 = vpop.permute.xlu1 %983  ;;  %v3821_v43 = vpop.permute.xlu0 %954 }
 0x2d3   : > { %v3823_v45 = vpop.permute.xlu1 %1014  ;;  %v3825_v46 = vpop.permute.xlu0 %985 }
 0x2d7   : > { %v3833_v50 = vpop.permute.xlu1 %1045  ;;  %v3835_v51 = vpop.permute.xlu0 %1016 }
 0x2db   : > { %v3847_v60 = vpop.permute.xlu1 %1076  ;;  %v3849_v61 = vpop.permute.xlu0 %1047 }
 0x2dc   : > { %v1050_v32 = vsel %vm1049_vm12, %v3833_v50, %v3849_v61 }
 0x2df   : > { %v736_v14 = vpop.permute.xlu1 %735  ;;  %v3880_v15 = vpop.permute.xlu0 %1078 }
 0x2e0   : > { %v740_v18 = vsel %vm739_vm5, %v734_v28, %v736_v14  ;;  %v741_v19 = vsel %vm739_vm5, %v736_v14, %v734_v28  ;;  %v938_v28 = vrot.slane %v3878_v13, %v3829_v48  ;;  %v896_v13 = vsel %vm894_vm8, %v3813_v38, %v3807_v35 }
 0x2e1   : > { %v755_v23 = vmul.f32 %v748_v4, %v741_v19  ;;  %v756_v24 = vmul.f32 %v752_v5, %v740_v18  ;;  %v927_v4 = vsel %vm925_vm7, %v3817_v40, %v3811_v37  ;;  %v996_v5 = vrot.slane %v3909_v41, %v3827_v47 }
 0x2e2   : > { %v942_v7 = vmul.f32 %v938_v28, %v927_v4  ;;  %v957_v14 = vsel %vm956_vm9, %v3815_v39, %v3821_v43  ;;  %v848_v18 = vmul.f32 %v841_v3, %v834_v33  ;;  %v958_v19 = vsel %vm956_vm9, %v3821_v43, %v3815_v39 }
 0x2e3   : > { %v2418_v44 = vpack.c.bf16 %v755_v23, %v722_v8  ;;  %v3911_v52 = vpop.permute.xlu1 %1107  ;;  %v3913_v53 = vpop.permute.xlu0 %1109  ;;  %v2419_v54 = vpack.c.bf16 %v756_v24, %v723_v9  ;;  %v2420_v9 = vpack.c.bf16 %v817_v56, %v786_v1  ;;  %v988_v37 = vsel %vm987_vm10, %v3819_v42, %v3825_v46  ;;  %v3989_v24 = vld [vmem:[#allocation17 + $0x18] sm:$0x3] }
 0x2e4   : > { %v895_v40 = vsel %vm894_vm8, %v3807_v35, %v3813_v38  ;;  %v911_v55 = vmul.f32 %v907_v17, %v896_v13  ;;  %v1031_v3 = vrot.slane %v3928_v63, %v3829_v48  ;;  %v2422_v20 = vpack.c.bf16 %v879_v11, %v848_v18  ;;  %v3991_v35 = vld [vmem:[#allocation17 + $0x1a] sm:$0x3] }
 0x2e5   : > { %1573 = vmatprep.subr.bf16.mxu1 %v2419_v54  ;;  %1876 = vmatprep.subr.bf16.mxu0 %v2419_v54  ;;  %v972_v22 = vmul.f32 %v965_v58, %v957_v14  ;;  %v1062_v23 = vrot.slane %v3962_v10, %v3829_v48  ;;  %v973_v38 = vmul.f32 %v969_v27, %v958_v19  ;;  %v2654_v14 = vld [vmem:[%s3699_s12] sm:$0xff]   ;;  %v1239_v19 = vld [vmem:[#allocation17 + $0x22] sm:$0x3]  ;;  %vm1266_vm5 = vcmp.lt.s32.totalorder %v3831_v49, 114  ;;  %s4403_s12 = sld [smem:[#allocation27_spill]] }
 0x2e6   : > { %1574 = vmatpush1.bf16.msra.mxu1 %v2418_v44  ;;  %1877 = vmatpush1.bf16.msra.mxu0 %v2418_v44  ;;  %v989_v17 = vsel %vm987_vm10, %v3825_v46, %v3819_v42  ;;  %v1004_v25 = vmul.f32 %v1000_v59, %v988_v37  ;;  %v2425_v28 = vpack.c.bf16 %v942_v7, %v911_v55  ;;  %vm1359_vm7 = vcmp.lt.s32.totalorder %v3831_v49, 97 }
 0x2e7   : > { %v3944_v6 = vpop.permute.xlu1 %1138  ;;  %v3946_v8 = vpop.permute.xlu0 %1140  ;;  %1575 = vmatprep.subr.bf16.mxu1 %v2421_v0  ;;  %1878 = vmatprep.subr.bf16.mxu0 %v2421_v0  ;;  %v910_v26 = vmul.f32 %v903_v12, %v895_v40  ;;  %v1089_v42 = vrot.slane %v3989_v24, %v3827_v47  ;;  %v1124_v46 = vrot.slane %v3991_v35, %v3829_v48  ;;  %vm1390_vm8 = vcmp.lt.s32.totalorder %v3831_v49, 96 }
 0x2e8   : > { %v2426_v44 = vpack.c.bf16 %v972_v22, %v972_v22  ;;  %v1003_v54 = vmul.f32 %v996_v5, %v989_v17  ;;  %v1019_v56 = vsel %vm1018_vm11, %v3823_v45, %v3835_v51  ;;  %v2427_v57 = vpack.c.bf16 %v973_v38, %v973_v38  ;;  %v1146_v5 = vld [vmem:[#allocation17 + $0x1c] sm:$0x3] }
 0x2e9   : > { %v2424_v41 = vpack.c.bf16 %v941_v21, %v910_v26  ;;  %v1051_v58 = vsel %vm1049_vm12, %v3849_v61, %v3833_v50  ;;  %v1066_v27 = vmul.f32 %v1062_v23, %v1050_v32  ;;  %v2429_v62 = vpack.c.bf16 %v1004_v25, %v973_v38  ;;  %v1301_v25 = vld [vmem:[#allocation17 + $0x26] sm:$0x3]  ;;  %v1270_v26 = vld [vmem:[#allocation17 + $0x24] sm:$0x3] }
 0x2ea   : > { %1576 = vmatpush1.bf16.msra.mxu1 %v2420_v9  ;;  %1879 = vmatpush1.bf16.msra.mxu0 %v2420_v9  ;;  %v1093_v0 = vrot.slane %v3989_v24, %v3829_v48  ;;  %v1120_v1 = vrot.slane %v3991_v35, %v3827_v47  ;;  %v1112_v4 = vsel %vm1111_vm14, %v3911_v52, %v3913_v53  ;;  %v1568_v34 = vsel %vm1566_vm15, %v2426_v44, 0 }
 0x2eb   : > { %v3983_v39 = vpop.permute.xlu1 %1169  ;;  %v3985_v43 = vpop.permute.xlu0 %1171  ;;  %1577 = vmatprep.subr.bf16.mxu1 %v2423_v16  ;;  %1880 = vmatprep.subr.bf16.mxu0 %v2423_v16  ;;  %v1020_v50 = vsel %vm1018_vm11, %v3835_v51, %v3823_v45  ;;  %v1035_v61 = vmul.f32 %v1031_v3, %v1019_v56  ;;  %v1065_v59 = vmul.f32 %v1058_v29, %v1051_v58  ;;  %vm1421_vm9 = vcmp.lt.s32.totalorder %v3831_v49, 95 }
 0x2ec   : > { %v1081_v9 = vsel %vm1080_vm13, %v3847_v60, %v3880_v15  ;;  %v1186_v45 = vrot.slane %v4024_v30, %v3829_v48  ;;  %v2428_v51 = vpack.c.bf16 %v1003_v54, %v972_v22  ;;  %v1113_v11 = vsel %vm1111_vm14, %v3913_v53, %v3911_v52 }
 0x2ed   : > { %v1128_v13 = vmul.f32 %v1124_v46, %v1112_v4  ;;  %v2431_v7 = vpack.c.bf16 %v1066_v27, %v1035_v61  ;;  %v1034_v10 = vmul.f32 %v1027_v31, %v1020_v50  ;;  %v1155_v16 = vrot.slane %v1146_v5, %v3829_v48  ;;  %v1208_v31 = vld [vmem:[#allocation17 + $0x20] sm:$0x3]  ;;  %v1363_v27 = vld [vmem:[#allocation17 + $0x2a] sm:$0x3] }
 0x2ee   : > { %1578 = vmatpush1.bf16.msra.mxu1 %v2422_v20  ;;  %1881 = vmatpush1.bf16.msra.mxu0 %v2422_v20  ;;  %v1174_v18 = vsel %vm1173_vm2, %v3983_v39, %v3985_v43  ;;  %v1082_v52 = vsel %vm1080_vm13, %v3880_v15, %v3847_v60  ;;  %v1097_v53 = vmul.f32 %v1093_v0, %v1081_v9  ;;  %vm1452_vm10 = vcmp.lt.s32.totalorder %v3831_v49, 94 }
 0x2ef   : > { %v4012_v2 = vpop.permute.xlu1 %1200  ;;  %v4014_v12 = vpop.permute.xlu0 %1202  ;;  %1579 = vmatprep.subr.bf16.mxu1 %v2425_v28  ;;  %1882 = vmatprep.subr.bf16.mxu0 %v2425_v28  ;;  %v1182_v63 = vrot.slane %v4024_v30, %v3827_v47  ;;  %v1127_v55 = vmul.f32 %v1120_v1, %v1113_v11  ;;  %v1143_v3 = vsel %vm1142_vm0, %v3944_v6, %v3946_v8 }
 0x2f0   : > { %v2430_v20 = vpack.c.bf16 %v1065_v59, %v1034_v10  ;;  %v1175_v60 = vsel %vm1173_vm2, %v3985_v43, %v3983_v39  ;;  %v1190_v15 = vmul.f32 %v1186_v45, %v1174_v18  ;;  %v1248_v21 = vrot.slane %v1239_v19, %v3829_v48 }
 0x2f1   : > { %v2433_v22 = vpack.c.bf16 %v1128_v13, %v1097_v53  ;;  %v1096_v23 = vmul.f32 %v1089_v42, %v1082_v52  ;;  %v1151_v35 = vrot.slane %v1146_v5, %v3827_v47  ;;  %v1217_v38 = vrot.slane %v1208_v31, %v3829_v48  ;;  %v1332_v5 = vld [vmem:[#allocation17 + $0x28] sm:$0x3] }
 0x2f2   : > { %1580 = vmatpush1.bf16.msra.mxu1 %v2424_v41  ;;  %1883 = vmatpush1.bf16.msra.mxu0 %v2424_v41  ;;  %v1144_v39 = vsel %vm1142_vm0, %v3946_v8, %v3944_v6  ;;  %v1159_v43 = vmul.f32 %v1155_v16, %v1143_v3  ;;  %v1244_v28 = vrot.slane %v1239_v19, %v3827_v47 }
 0x2f3   : > { %v1232_v33 = vpop.permute.xlu1 %1231  ;;  %v1234_v36 = vpop.permute.xlu0 %1233  ;;  %2347 = vmatprep.subr.msk.bf16.mxu1 %vm1566_vm15, %v2427_v57  ;;  %1884 = vmatprep.subr.bf16.mxu0 %v2429_v62  ;;  %v1189_v32 = vmul.f32 %v1182_v63, %v1175_v60  ;;  %v1205_v42 = vsel %vm1204_vm4, %v4012_v2, %v4014_v12  ;;  %v2432_v46 = vpack.c.bf16 %v1127_v55, %v1096_v23  ;;  %v1394_v63 = vld [vmem:[#allocation17 + $0x2c] sm:$0x3]  ;;  %v1425_v55 = vld [vmem:[#allocation17 + $0x2e] sm:$0x3] }
 0x2f4   : > { %v1237_v17 = vsel %vm1235_vm3, %v1234_v36, %v1232_v33  ;;  %v1236_v6 = vsel %vm1235_vm3, %v1232_v33, %v1234_v36  ;;  %v1310_v41 = vrot.slane %v1301_v25, %v3829_v48  ;;  %v2435_v44 = vpack.c.bf16 %v1190_v15, %v1159_v43 }
 0x2f5   : > { %v1252_v8 = vmul.f32 %v1248_v21, %v1237_v17  ;;  %v1158_v54 = vmul.f32 %v1151_v35, %v1144_v39  ;;  %v1213_v56 = vrot.slane %v1208_v31, %v3827_v47  ;;  %v1279_v57 = vrot.slane %v1270_v26, %v3829_v48 }
 0x2f6   : > { %1582 = vmatpush1.bf16.msra.mxu1 %v1568_v34  ;;  %1885 = vmatpush1.bf16.msra.mxu0 %v2428_v51  ;;  %v1206_v30 = vsel %vm1204_vm4, %v4014_v12, %v4012_v2  ;;  %v1221_v62 = vmul.f32 %v1217_v38, %v1205_v42  ;;  %v1306_v0 = vrot.slane %v1301_v25, %v3827_v47  ;;  %v1456_v38 = vld [vmem:[#allocation17 + $0x30] sm:$0x3] }
 0x2f7   : > { %v1263_v37 = vpop.permute.xlu1 %1262  ;;  %v1265_v40 = vpop.permute.xlu0 %1264  ;;  %1886 = vmatprep.subr.bf16.mxu0 %v2431_v7  ;;  %v1251_v50 = vmul.f32 %v1244_v28, %v1236_v6  ;;  %v2434_v33 = vpack.c.bf16 %v1189_v32, %v1158_v54  ;;  %v1372_v12 = vrot.slane %v1363_v27, %v3829_v48  ;;  %v1220_v9 = vmul.f32 %v1213_v56, %v1206_v30 }
 0x2f8   : > { %v1268_v61 = vsel %vm1266_vm5, %v1265_v40, %v1263_v37  ;;  %v2437_v59 = vpack.c.bf16 %v1252_v8, %v1221_v62  ;;  %v1275_v45 = vrot.slane %v1270_v26, %v3827_v47  ;;  %v1267_v51 = vsel %vm1266_vm5, %v1263_v37, %v1265_v40 }
 0x2f9   : > { %2348 = vmatmul.mubr.msk.bf16.vlgmr.msra.gmra.mrb[4].mxu1 %vm1562_vm1, %v2654_v14  ;;  %vm1297_vm1 = vcmp.lt.s32.totalorder %v3831_v49, 110  ;;  %v1283_v11 = vmul.f32 %v1279_v57, %v1268_v61  ;;  %v1341_v13 = vrot.slane %v1332_v5, %v3829_v48  ;;  %v1368_v7 = vrot.slane %v1363_v27, %v3827_v47  ;;  %v2655_v61 = vld [vmem:[%s3705_s6] ss:$8 sps:$4 sm:$0xff]   ;;  %s4404_s6 = sld [smem:[#allocation31_spill]] }
 0x2fa   : > { %1887 = vmatpush1.bf16.msra.mxu0 %v2430_v20  ;;  %v2436_v19 = vpack.c.bf16 %v1251_v50, %v1220_v9  ;;  %v1282_v37 = vmul.f32 %v1275_v45, %v1267_v51  ;;  %v1337_v40 = vrot.slane %v1332_v5, %v3827_v47  ;;  %v1403_v23 = vrot.slane %v1394_v63, %v3829_v48 }
 0x2fb   : > { %v1294_v24 = vpop.permute.xlu1 %1293  ;;  %v1296_v29 = vpop.permute.xlu0 %1295  ;;  %1888 = vmatprep.subr.bf16.mxu0 %v2433_v22  ;;  %v1399_v22 = vrot.slane %v1394_v63, %v3827_v47  ;;  %v1430_v17 = vrot.slane %v1425_v55, %v3827_v47  ;;  %v1434_v25 = vrot.slane %v1425_v55, %v3829_v48  ;;  %v1461_v32 = vrot.slane %v1456_v38, %v3827_v47 }
 0x2fc   : > { %v1299_v58 = vsel %vm1297_vm1, %v1296_v29, %v1294_v24  ;;  %v1298_v36 = vsel %vm1297_vm1, %v1294_v24, %v1296_v29  ;;  %v1465_v8 = vrot.slane %v1456_v38, %v3829_v48 }
 0x2fd   : > { %v1314_v2 = vmul.f32 %v1310_v41, %v1299_v58  ;;  %v1313_v10 = vmul.f32 %v1306_v0, %v1298_v36 }
 0x2fe   : > { %1889 = vmatpush1.bf16.msra.mxu0 %v2432_v46 }
 0x2ff   : > { %v1325_v1 = vpop.permute.xlu1 %1324  ;;  %v1327_v4 = vpop.permute.xlu0 %1326  ;;  %1890 = vmatprep.subr.bf16.mxu0 %v2435_v44  ;;  %v2439_v31 = vpack.c.bf16 %v1314_v2, %v1283_v11  ;;  %v2438_v35 = vpack.c.bf16 %v1313_v10, %v1282_v37  ;;  %s2417_s14 = sshll.u32 %s4404_s6, 2  ;;  %s3140_s6 = smov [#allocation18]  }
 0x300   : > { %v1330_v16 = vsel %vm1328_vm6, %v1327_v4, %v1325_v1  ;;  %v1329_v3 = vsel %vm1328_vm6, %v1325_v1, %v1327_v4  ;;  %s4199_s30 = sadd.s32 %s2417_s14, %s2382_s19  ;;  %s2934_s28 = sshll.u32 %s3140_s6, 4  ;;  %s2935_s28 = int_to_ptr.vmem [resolvable:$false] %s2934_s28 }
 0x301   : > { %v1345_v20 = vmul.f32 %v1341_v13, %v1330_v16  ;;  %v1344_v43 = vmul.f32 %v1337_v40, %v1329_v3  ;;  %s2383_s9 = sshll.u32 %s4199_s30, 7 }
 0x302   : > { %1891 = vmatpush1.bf16.msra.mxu0 %v2434_v33  ;;  %s4209_s7 = scalar_lea.hbm %s4407_s0, %s2383_s9 }
 0x303   : > { %v1356_v34 = vpop.permute.xlu1 %1355  ;;  %v1358_v14 = vpop.permute.xlu0 %1357  ;;  %1892 = vmatprep.subr.bf16.mxu0 %v2437_v59 }
 0x304   : > { %v1361_v18 = vsel %vm1359_vm7, %v1358_v14, %v1356_v34  ;;  %v1360_v52 = vsel %vm1359_vm7, %v1356_v34, %v1358_v14 }
 0x305   : > { %v1376_v53 = vmul.f32 %v1372_v12, %v1361_v18  ;;  %v1375_v21 = vmul.f32 %v1368_v7, %v1360_v52 }
 0x306   : > { %1893 = vmatpush1.bf16.msra.mxu0 %v2436_v19 }
 0x307   : > { %v1387_v60 = vpop.permute.xlu1 %1386  ;;  %v1389_v15 = vpop.permute.xlu0 %1388  ;;  %1894 = vmatprep.subr.bf16.mxu0 %v2439_v31  ;;  %v2441_v39 = vpack.c.bf16 %v1376_v53, %v1345_v20  ;;  %v2440_v6 = vpack.c.bf16 %v1375_v21, %v1344_v43 }
 0x308   : > { %v1391_v28 = vsel %vm1390_vm8, %v1387_v60, %v1389_v15  ;;  %v1392_v26 = vsel %vm1390_vm8, %v1389_v15, %v1387_v60 }
 0x309   : > { %v1406_v41 = vmul.f32 %v1399_v22, %v1391_v28  ;;  %v1407_v44 = vmul.f32 %v1403_v23, %v1392_v26 }
 0x30a   : > { %1895 = vmatpush1.bf16.msra.mxu0 %v2438_v35 }
 0x30b   : > { %v1418_v24 = vpop.permute.xlu1 %1417  ;;  %v1420_v29 = vpop.permute.xlu0 %1419  ;;  %1896 = vmatprep.subr.bf16.mxu0 %v2441_v39 }
 0x30c   : > { %v1422_v42 = vsel %vm1421_vm9, %v1418_v24, %v1420_v29  ;;  %v1423_v46 = vsel %vm1421_vm9, %v1420_v29, %v1418_v24 }
 0x30d   : > { %v1437_v54 = vmul.f32 %v1430_v17, %v1422_v42  ;;  %v1438_v56 = vmul.f32 %v1434_v25, %v1423_v46 }
 0x30e   : > { %1897 = vmatpush1.bf16.msra.mxu0 %v2440_v6 }
 0x30f   : > { %v1449_v57 = vpop.permute.xlu1 %1448  ;;  %v1451_v58 = vpop.permute.xlu0 %1450  ;;  %v2443_v27 = vpack.c.bf16 %v1438_v56, %v1407_v44  ;;  %v2442_v30 = vpack.c.bf16 %v1437_v54, %v1406_v41 }
 0x310   : > { %v1453_v62 = vsel %vm1452_vm10, %v1449_v57, %v1451_v58  ;;  %v1454_v47 = vsel %vm1452_vm10, %v1451_v58, %v1449_v57 }
 0x311   : > { %v1468_v0 = vmul.f32 %v1461_v32, %v1453_v62  ;;  %v1469_v1 = vmul.f32 %v1465_v8, %v1454_v47  ;;  %1898 = vmatprep.subr.bf16.mxu0 %v2443_v27 }
 0x312   : > { %1899 = vmatpush1.bf16.msra.mxu0 %v2442_v30 }
 0x313   : > { %v2444_v48 = vpack.c.bf16 %v1468_v0, %v1468_v0  ;;  %v2445_v4 = vpack.c.bf16 %v1469_v1, %v1469_v1 }
 0x315   : > { %2377 = vmatprep.subr.msk.bf16.mxu0 %vm1566_vm15, %v2445_v4  ;;  %v1871_v50 = vsel %vm1566_vm15, %v2444_v48, 0 }
 0x316   : > { %1901 = vmatpush1.bf16.msra.mxu0 %v1871_v50 }
 0x319   : > { %1909 = vmatmul.mubr.bf16.vlgmr.msra.gmra.mrb[0].mxu0 %v2655_v61 }
 0x320   : > { %v1505_v5 = vpop.permute.xlu1 %1504  ;;  %v1510_v12 = vpop.permute.xlu0 %1509 }
 0x324   : > { %v1726_v34 = vpop.permute.xlu1 %1725  ;;  %v1731_v16 = vpop.permute.xlu0 %1730 }
 0x3cc   : > { %v1607_v33 = vpop.f32.mrb[4].mxu1 }
 0x3cd   : > { %v1609_v36 = vpop.f32.mrb[5].mxu1  ;;  %v1608_v2 = vadd.f32 %v1607_v33, %v1505_v5  ;;  %v1488_v33 = vld [vmem:[%s3715_s18 + $0x8] sm:$0xff] }
 0x3ce   : > { %v1611_v49 = vpop.f32.mrb[6].mxu1  ;;  %v1610_v59 = vadd.f32 %v1609_v36, %v1505_v5  ;;  %v1487_v5 = vld [vmem:[%s3715_s18] sm:$0xff] }
 0x3cf   : > { %v1612_v9 = vadd.f32 %v1611_v49, %v1510_v12  ;;  %v1613_v45 = vpop.f32.mrb[7].mxu1 }
 0x3d0   : > { %v1614_v51 = vadd.f32 %v1613_v45, %v1510_v12  ;;  %v1616_v11 = vadd.f32 %v1610_v59, %v1608_v2 }
 0x3d2   : > { %v1619_v13 = vadd.f32 %v1614_v51, %v1612_v9  ;;  %1617 = vadd.xlane.f32.xlu1 %v1616_v11 }
 0x3d4   : > { %1620 = vadd.xlane.f32.xlu0 %v1619_v13 }
 0x3ec   : > { %v1910_v7 = vpop.f32.mrb[0].mxu0 }
 0x3ed   : > { %v1911_v14 = vadd.f32 %v1910_v7, %v1726_v34  ;;  %v1912_v10 = vpop.f32.mrb[1].mxu0  ;;  %v1484_v7 = vld [vmem:[%s3713_s15 + $0x8] sm:$0xff] }
 0x3ee   : > { %v1913_v18 = vadd.f32 %v1912_v10, %v1726_v34  ;;  %v1914_v19 = vpop.f32.mrb[2].mxu0 }
 0x3ef   : > { %v1915_v52 = vadd.f32 %v1914_v19, %v1731_v16  ;;  %v1916_v53 = vpop.f32.mrb[3].mxu0 }
 0x3f0   : > { %v1917_v63 = vadd.f32 %v1916_v53, %v1731_v16  ;;  %v1919_v31 = vadd.f32 %v1913_v18, %v1911_v14 }
 0x3f2   : > { %1920 = vadd.xlane.f32.xlu0 %v1919_v31  ;;  %v1922_v37 = vadd.f32 %v1917_v63, %v1915_v52 }
 0x3f4   : > { %1923 = vadd.xlane.f32.xlu1 %v1922_v37 }
 0x45f   : > { %v1618_v40 = vpop.xlane.xlu1 %1617 }
 0x461   : > { %v1621_v55 = vpop.xlane.xlu0 %1620 }
 0x462   : > { %v1622_v3 = vadd.f32 %v1621_v55, %v1618_v40 }
 0x464   : > { %v1623_v20 = vrot.slane %v1622_v3, 4 }
 0x466   : > { %v1624_v60 = vadd.f32 %v1623_v20, %v1622_v3 }
 0x468   : > { %v1625_v15 = vrot.slane %v1624_v60, 2 }
 0x46a   : > { %v1626_v21 = vadd.f32 %v1625_v15, %v1624_v60  ;;  %v1486_v15 = vld [vmem:[%s3713_s15 + $0x18] sm:$0xff] }
 0x46c   : > { %v1627_v22 = vrot.slane %v1626_v21, 1 }
 0x46e   : > { %v1628_v23 = vadd.f32 %v1627_v22, %v1626_v21  ;;  %v1485_v21 = vld [vmem:[%s3713_s15 + $0x10] sm:$0xff] }
 0x470   : > { %v1629_v35 = vmul.f32 0.00024414063, %v1628_v23 }
 0x472   : > { %v4146_v38 = vsub.f32 %v1612_v9, %v1629_v35  ;;  %v4148_v17 = vsub.f32 %v1614_v51, %v1629_v35  ;;  %v4150_v25 = vsub.f32 %v1608_v2, %v1629_v35  ;;  %v4152_v39 = vsub.f32 %v1610_v59, %v1629_v35 }
 0x474   : > { %v1636_v43 = vmul.f32 %v4146_v38, %v4146_v38  ;;  %v1637_v28 = vmul.f32 %v4148_v17, %v4148_v17  ;;  %v1634_v26 = vmul.f32 %v4150_v25, %v4150_v25  ;;  %v1635_v24 = vmul.f32 %v4152_v39, %v4152_v39 }
 0x476   : > { %v1641_v29 = vadd.f32 %v1637_v28, %v1636_v43  ;;  %v1638_v32 = vadd.f32 %v1635_v24, %v1634_v26  ;;  %v1490_v43 = vld [vmem:[%s3715_s18 + $0x18] sm:$0xff]  ;;  %v1489_v28 = vld [vmem:[%s3715_s18 + $0x10] sm:$0xff] }
 0x478   : > { %1642 = vadd.xlane.f32.xlu1 %v1641_v29  ;;  %1639 = vadd.xlane.f32.xlu0 %v1638_v32 }
 0x47f   : > { %v1921_v42 = vpop.xlane.xlu0 %1920 }
 0x481   : > { %v1924_v46 = vpop.xlane.xlu1 %1923 }
 0x482   : > { %v1925_v6 = vadd.f32 %v1924_v46, %v1921_v42 }
 0x484   : > { %v1926_v8 = vrot.slane %v1925_v6, 4 }
 0x486   : > { %v1927_v41 = vadd.f32 %v1926_v8, %v1925_v6 }
 0x488   : > { %v1928_v44 = vrot.slane %v1927_v41, 2 }
 0x48a   : > { %v1929_v54 = vadd.f32 %v1928_v44, %v1927_v41 }
 0x48c   : > { %v1930_v56 = vrot.slane %v1929_v54, 1 }
 0x48e   : > { %v1931_v57 = vadd.f32 %v1930_v56, %v1929_v54 }
 0x490   : > { %v1932_v58 = vmul.f32 0.00024414063, %v1931_v57 }
 0x492   : > { %v4162_v27 = vsub.f32 %v1915_v52, %v1932_v58  ;;  %v4164_v30 = vsub.f32 %v1917_v63, %v1932_v58  ;;  %v4166_v62 = vsub.f32 %v1911_v14, %v1932_v58  ;;  %v4168_v47 = vsub.f32 %v1913_v18, %v1932_v58  ;;  %v1483_v14 = vld [vmem:[%s3713_s15] sm:$0xff]  ;;  %s641_s15 = sand.u32 1, %s4403_s12  }
 0x493   : > { %s2309_s18 = sshll.u32 %s641_s15, 5  ;;  %s4213_s13 = scalar_lea.sflag [#allocation5], %s641_s15 }
 0x494   : > { %v1939_v0 = vmul.f32 %v4162_v27, %v4162_v27  ;;  %v1940_v1 = vmul.f32 %v4164_v30, %v4164_v30  ;;  %v1937_v48 = vmul.f32 %v4166_v62, %v4166_v62  ;;  %v1938_v4 = vmul.f32 %v4168_v47, %v4168_v47  ;;  %s643_s25 = scalar_lea.vmem [#allocation18], %s2309_s18  ;;  %s2936_s18 = scalar_lea.vmem %s2935_s28, 1024 }
 0x495   : > { %s2024_s10 = sshll.u32 %s643_s25, 4  ;;  %s4204_s10 = int_to_ptr.vmem [resolvable:$true] %s2024_s10 }
 0x496   : > { %v1944_v50 = vadd.f32 %v1940_v1, %v1939_v0  ;;  %v1941_v61 = vadd.f32 %v1938_v4, %v1937_v48  ;;  %s2930_s8 = scalar_lea.vmem %s4204_s10, 512  ;;  %p2937_p11 = scmp.lt.s32.totalorder %s4204_s10, %s2935_s28 }
 0x497   : > { %p2931_p6 = scmp.ne.s32.totalorder %s4204_s10, %s2930_s8  ;;  %p2938_p7 = scmp.lt.s32.totalorder %s2936_s18, %s2930_s8 }
 0x498   : > { %1945 = vadd.xlane.f32.xlu1 %v1944_v50  ;;  %1942 = vadd.xlane.f32.xlu0 %v1941_v61 }
 0x499   : > { %p2932_p3 = pnand %p2931_p6, %p4408_p9  ;;  %p2939_p2 = por %p2938_p7, %p2937_p11 }
 0x49b   : > { %p2933_p10 = pneg %p2932_p3 }
 0x49d   : > { %p2940_p1 = pnand %p2939_p2, %p2933_p10 }
 0x4a9   : > { %1672 = vperm.xlu1 %2653, %v1487_v5  }
 0x4ae   : > { %1677 = vperm.xlu0 %2652, %v1488_v33  }
 0x505   : > { %v1640_v36 = vpop.xlane.xlu0 %1639  ;;  %v1643_v2 = vpop.xlane.xlu1 %1642 }
 0x506   : > { %v1644_v12 = vadd.f32 %v1643_v2, %v1640_v36 }
 0x508   : > { %v1645_v49 = vrot.slane %v1644_v12, 4 }
 0x50a   : > { %v1646_v59 = vadd.f32 %v1645_v49, %v1644_v12 }
 0x50c   : > { %v1647_v9 = vrot.slane %v1646_v59, 2 }
 0x50e   : > { %v1648_v45 = vadd.f32 %v1647_v9, %v1646_v59 }
 0x510   : > { %v1649_v51 = vrot.slane %v1648_v45, 1 }
 0x512   : > { %v1650_v11 = vadd.f32 %v1649_v51, %v1648_v45 }
 0x514   : > { %v1651_v13 = vmul.f32 0.00024414063, %v1650_v11 }
 0x516   : > { %v1652_v34 = vadd.f32 1e-05, %v1651_v13 }
 0x518   : > { %2658 = vrsqrt.f32 %v1652_v34 }
 0x522   : > { %v2659_v10 = vpop.eup %2658 }
 0x523   : > { %v1655_v16 = vmul.f32 %v2659_v10, %v1484_v7  ;;  %v1654_v18 = vmul.f32 %v2659_v10, %v1483_v14 }
 0x525   : > { %v1943_v19 = vpop.xlane.xlu0 %1942  ;;  %1663 = vperm.xlu1 %2653, %v1655_v16   ;;  %1658 = vperm.xlu0 %2652, %v1654_v18   ;;  %v1946_v52 = vpop.xlane.xlu1 %1945 }
 0x526   : > { %v1947_v53 = vadd.f32 %v1946_v52, %v1943_v19 }
 0x528   : > { %v1948_v63 = vrot.slane %v1947_v53, 4 }
 0x529   : > { %v1673_v24 = vpop.permute.xlu1 %1672 }
 0x52a   : > { %v1949_v31 = vadd.f32 %v1948_v63, %v1947_v53 }
 0x52c   : > { %v1950_v37 = vrot.slane %v1949_v31, 2 }
 0x52d   : > { %v1678_v26 = vpop.permute.xlu0 %1677 }
 0x52e   : > { %v1951_v40 = vadd.f32 %v1950_v37, %v1949_v31 }
 0x530   : > { %v1952_v55 = vrot.slane %v1951_v40, 1 }
 0x532   : > { %v1953_v3 = vadd.f32 %v1952_v55, %v1951_v40 }
 0x534   : > { %v1954_v20 = vmul.f32 0.00024414063, %v1953_v3 }
 0x536   : > { %v1955_v60 = vadd.f32 1e-05, %v1954_v20 }
 0x538   : > { %2660 = vrsqrt.f32 %v1955_v60 }
 0x542   : > { %v2661_v22 = vpop.eup %2660 }
 0x543   : > { %v1958_v23 = vmul.f32 %v2661_v22, %v1486_v15  ;;  %v1957_v35 = vmul.f32 %v2661_v22, %v1485_v21 }
 0x545   : > { %1966 = vperm.xlu0 %2652, %v1958_v23   ;;  %1961 = vperm.xlu1 %2653, %v1957_v35  }
 0x549   : > { %1980 = vperm.xlu0 %2652, %v1490_v43   ;;  %1975 = vperm.xlu1 %2653, %v1489_v28  }
 0x5a4   : > { %v1659_v29 = vpop.permute.xlu0 %1658  ;;  %v1664_v32 = vpop.permute.xlu1 %1663 }
 0x5a5   : > { %v1666_v42 = vmul.f32 %v1659_v29, %v4150_v25  ;;  %v1667_v46 = vmul.f32 %v1659_v29, %v4152_v39  ;;  %v1668_v6 = vmul.f32 %v1664_v32, %v4146_v38  ;;  %v1669_v8 = vmul.f32 %v1664_v32, %v4148_v17 }
 0x5a7   : > { %v1680_v41 = vadd.f32 %v1673_v24, %v1666_v42  ;;  %v1681_v44 = vadd.f32 %v1673_v24, %v1667_v46  ;;  %v1682_v54 = vadd.f32 %v1678_v26, %v1668_v6  ;;  %v1683_v56 = vadd.f32 %v1678_v26, %v1669_v8 }
 0x5a9   : > { %vm1684_vm11 = vcmp.gt.f32.partialorder %v1680_v41, 0.0  ;;  %vm1685_vm12 = vcmp.gt.f32.partialorder %v1681_v44, 0.0  ;;  %v1688_v25 = vmul.f32 0.2, %v1680_v41  ;;  %v1689_v0 = vmul.f32 0.2, %v1681_v44 }
 0x5aa   : > { %v1690_v48 = vmul.f32 0.2, %v1682_v54  ;;  %v1691_v4 = vmul.f32 0.2, %v1683_v56  ;;  %vm1686_vm13 = vcmp.gt.f32.partialorder %v1682_v54, 0.0  ;;  %vm1687_vm14 = vcmp.gt.f32.partialorder %v1683_v56, 0.0 }
 0x5ac   : > { %v1694_v59 = vsel %vm1686_vm13, %v1682_v54, %v1690_v48  ;;  %v1695_v9 = vsel %vm1687_vm14, %v1683_v56, %v1691_v4 }
 0x5c4   : > { %v1967_v57 = vpop.permute.xlu0 %1966  ;;  %v1962_v58 = vpop.permute.xlu1 %1961 }
 0x5c5   : > { %v1971_v39 = vmul.f32 %v1967_v57, %v4162_v27  ;;  %v1972_v38 = vmul.f32 %v1967_v57, %v4164_v30  ;;  %v1969_v17 = vmul.f32 %v1962_v58, %v4166_v62  ;;  %v1970_v1 = vmul.f32 %v1962_v58, %v4168_v47 }
 0x5c6   : > { %v1692_v27 = vsel %vm1684_vm11, %v1680_v41, %v1688_v25  ;;  %v1693_v30 = vsel %vm1685_vm12, %v1681_v44, %v1689_v0 }
 0x5c8   : > { %v1981_v50 = vpop.permute.xlu0 %1980  ;;  %v1976_v61 = vpop.permute.xlu1 %1975 }
 0x5c9   : > { %v1985_v5 = vadd.f32 %v1981_v50, %v1971_v39  ;;  %v1986_v33 = vadd.f32 %v1981_v50, %v1972_v38  ;;  %v1983_v36 = vadd.f32 %v1976_v61, %v1969_v17  ;;  %v1984_v2 = vadd.f32 %v1976_v61, %v1970_v1 }
 0x5cb   : > { %vm1989_vm15 = vcmp.gt.f32.partialorder %v1985_v5, 0.0  ;;  %vm1990_vm0 = vcmp.gt.f32.partialorder %v1986_v33, 0.0  ;;  %v1993_v62 = vmul.f32 0.2, %v1985_v5  ;;  %v1994_v47 = vmul.f32 0.2, %v1986_v33 }
 0x5cc   : > { %vm1987_vm2 = vcmp.gt.f32.partialorder %v1983_v36, 0.0  ;;  %vm1988_vm3 = vcmp.gt.f32.partialorder %v1984_v2, 0.0  ;;  %v1991_v12 = vmul.f32 0.2, %v1983_v36  ;;  %v1992_v49 = vmul.f32 0.2, %v1984_v2 }
 0x5cd   : > { %v1997_v45 = vsel %vm1989_vm15, %v1985_v5, %v1993_v62  ;;  %v1998_v51 = vsel %vm1990_vm0, %v1986_v33, %v1994_v47 }
 0x5ce   : > { %v2001_v11 = vadd.f32 %v1997_v45, %v1694_v59  ;;  %v2002_v13 = vadd.f32 %v1998_v51, %v1695_v9  ;;  %v1995_v34 = vsel %vm1987_vm2, %v1983_v36, %v1991_v12  ;;  %v1996_v7 = vsel %vm1988_vm3, %v1984_v2, %v1992_v49 }
 0x5cf   : > { %v1999_v14 = vadd.f32 %v1995_v34, %v1692_v27  ;;  %v2000_v10 = vadd.f32 %v1996_v7, %v1693_v30 }
 0x5d0   : > { %2005 = vst [vmem:[%s643_s25 + $0x10] sm:$0xff] %v2001_v11  ;;  %2006 = vst [vmem:[%s643_s25 + $0x18] sm:$0xff] %v2002_v13 }
 0x5d1   : > { %2003 = vst [vmem:[%s643_s25] sm:$0xff] %v1999_v14  ;;  %2004 = vst [vmem:[%s643_s25 + $0x8] sm:$0xff] %v2000_v10 }
 0x5d2   : > { %2943 = shalt.err (!%p2940_p1)
}
 0x5d3   : > { %s2944_s12 = scalar_lea.hbm %s4209_s7, 512  ;;  %s2948_s19 = scalar_lea.hbm %s4407_s0, 4096 }
 0x5d4   : > { %p2945_p8 = scmp.ne.s32.totalorder %s4209_s7, %s2944_s12  ;;  %p2949_p12 = scmp.lt.u32.totalorder %s4209_s7, %s4407_s0 }
 0x5d5   : > { %p2950_p4 = scmp.lt.u32.totalorder %s2948_s19, %s2944_s12  ;;  %p2952_p6 = scmp.lt.u32.totalorder %s2944_s12, %s4209_s7 }
 0x5d6   : > { %p2946_p5 = pnand %p2945_p8, %p4408_p9 }
 0x5d7   : > { %p2951_p0 = por %p2950_p4, %p2949_p12 }
 0x5d8   : > { %p2947_p13 = pneg %p2946_p5 }
 0x5d9   : > { %p2953_p3 = por %p2952_p6, %p2951_p0 }
 0x5db   : > { %p2954_p10 = pnand %p2953_p3, %p2947_p13 }
 0x5dd   : > { %2957 = shalt.err (!%p2954_p10)
}
 0x5de   : > { %s3141_s9 = smov 256  }
 0x5df   : > { %2466 = dma.vmem_to_hbm [thread:$0]  (%p4408_p9), %s4204_s10, 512, %s4209_s7, %s4213_s13, %s3141_s9, %s3141_s9, %s3116_s23  }
 0x5e0 PF: > { %s4409_s27 = sld [smem:[#allocation26_spill]]  ;;  %s4410_s29 = sld [smem:[#allocation37_spill]] }
 0x5e1   : > { %p2504_p11 = scmp.ge.s32.totalorder %s3096_s22, 2 }
 0x5e6   : > { %s2039_s8 = sand.u32 1, %s4409_s27   ;;  %p4411_p7 = scmp.ne.s32.totalorder %s4410_s29, 0 }
 0x5e7   : > { %s2040_s6 = scalar_lea.sflag [#allocation5], %s2039_s8 }
 0x5e8   : > { %p2498_p2 = pnand %p2504_p11, %p4411_p7 }
 0x5ea   : > { %3039 = dma.done.wait (!%p2498_p2), %s2040_s6, 512  }
 0x5eb   : > { %3041 = vsyncadd (!%p2498_p2), %s2040_s6, 4294966784  ;;  %s37_s22 = sadd.s32 1, %s3096_s22   ;;  %s4413_s30 = sld [smem:[#allocation27_spill]] }
 0x5ec   : > { %p4243_p1 = scmp.ge.s32.totalorder %s37_s22, 10   ;;  %s4414_s12 = sld [smem:[#allocation28_spill]] }
 0x5ed   : > { %s4415_s13 = sld [smem:[#allocation29_spill]]  ;;  %s4416_s14 = sld [smem:[#allocation40_spill]] }
 0x5ee   : > { %s4417_s15 = sld [smem:[#allocation30_spill]]  ;;  %s4418_s23 = sld [smem:[#allocation39_spill]] }
 0x5ef   : > { %s4419_s10 = smov %s3052_s11  ;;  %s4420_s11 = smov %s3505_s16 }
 0x5f0   : > { %s4421_s16 = smov %s3076_s17  ;;  %s4422_s17 = smov %s3502_s5 }
 0x5f1   : > { %s4423_s18 = smov %s3088_s20  ;;  %s4424_s19 = smov %s3092_s21 }
 0x5f2   : > { %s4426_s21 = smov %s4432_s26  ;;  %36 = sbr.rel (!%p4243_p1) target bundleno = 27 (0x1b), region = 214 }
 0x5f4   : > { %s4425_s20 = smov %s4418_s23 }
 0x5f9   :  { %2045 = vsyncpa [#allocation4], 1 }
 0x5fa   :  { %2047 = vsyncpa [#allocation4 + $0x1], 1 }
 0x5fb   :  { %2048 = vsyncpa [#allocation7], 1 }
 0x5fc   :  { %2050 = vsyncpa [#allocation7 + $0x1], 1 }
 0x5fd   :  { %2051 = vsyncpa [#allocation10], 1 }
 0x5fe   :  { %2053 = vsyncpa [#allocation10 + $0x1], 1 }
 0x5ff   :  { %2054 = vsyncpa [#allocation13], 1 }
 0x600   :  { %2056 = vsyncpa [#allocation13 + $0x1], 1 }
 0x601   :  { %2057 = vsyncpa [#allocation16], 1 }
 0x602   :  { %2059 = vsyncpa [#allocation16 + $0x1], 1 }
 0x603   :  { %2060 = vsyncpa [#allocation5], 1 }
 0x604   :  { %2062 = vsyncpa [#allocation5 + $0x1], 1 }

</bundles_post_ra>
